<compile_context>
chip_gen: v7x
topology: tpu7x:2x2x1
jax: 0.10.0
libtpu: 0.0.40
codegen_flags: <defaults>
</compile_context>

<pallas_src>
from functools import partial

import jax
import jax.numpy as jnp
from jax.experimental import pallas as pl
from jax.experimental.pallas import tpu as pltpu

BN_EPS = 1e-5
LANE = 128
SUBLANE = 8


def _round_up(x, m):
    return (x + m - 1) // m * m


def _cdiv(a, b):
    return (a + b - 1) // b


# --------------------------------------------------------------------------- kernel
def _mlp_kernel(num_blocks, x_ref, *args):
    """Fused MLP forward on one batch tile.

    args = (w1_0, w2_0, ..., w1_{nb-1}, w2_{nb-1}, bias_ref, o_ref)

    Per hidden block (BN folded into W2'/b2' on host; Dropout identity in eval):
        h = relu(h @ W1 + b1)
        h = relu(h @ W2' + b2')
    Weights are bf16 (MXU-native rate); activations cast to bf16 only for the dot
    operands; bias-add / ReLU / final reduction stay f32.  Final Linear(D, 1) is a
    VPU multiply + lane reduction written as one contiguous (TB, 1) store.
    """
    *w_refs, bias_ref, o_ref = args
    h = x_ref[...]                                              # (TB, Dp) f32
    for blk in range(num_blocks):
        w1 = w_refs[2 * blk][...]                               # (Pin, Pout) bf16
        w2 = w_refs[2 * blk + 1][...]                           # (Pout, Pout) bf16
        pout = w1.shape[1]
        b1 = bias_ref[2 * blk:2 * blk + 1, :pout]               # (1, Pout) f32
        b2 = bias_ref[2 * blk + 1:2 * blk + 2, :pout]           # (1, Pout) f32
        h = jnp.maximum(
            jnp.dot(h.astype(jnp.bfloat16), w1,
                    preferred_element_type=jnp.float32) + b1, 0.0)
        h = jnp.maximum(
            jnp.dot(h.astype(jnp.bfloat16), w2,
                    preferred_element_type=jnp.float32) + b2, 0.0)

    p_last = h.shape[1]
    w_out = bias_ref[2 * num_blocks:2 * num_blocks + 1, :p_last]      # (1, P_last)
    b_out = bias_ref[2 * num_blocks + 1:2 * num_blocks + 2, 0:1]      # (1, 1)
    out = jnp.sum(h * w_out, axis=-1, keepdims=True) + b_out
    o_ref[...] = out.astype(o_ref.dtype)


# ----------------------------------------------------------------- params / packing
def init_params(key, input_dim):
    """PyTorch-style init (Linear: U(+-1/sqrt(fan_in)); BN stats randomized a bit so
    the host-side BN fold is actually exercised by the correctness check)."""
    sizes = [input_dim, 4 * input_dim, 8 * input_dim, 4 * input_dim,
             4 * input_dim, 2 * input_dim, 2 * input_dim, input_dim]
    blocks = []
    prev = input_dim
    for hsz in sizes:
        key, k1, k2, k3, k4, k5, k6, k7, k8 = jax.random.split(key, 9)
        lim1 = 1.0 / (prev ** 0.5)
        w1 = jax.random.uniform(k1, (prev, hsz), jnp.float32, -lim1, lim1)
        b1 = jax.random.uniform(k2, (hsz,), jnp.float32, -lim1, lim1)
        lim2 = 1.0 / (hsz ** 0.5)
        w2 = jax.random.uniform(k3, (hsz, hsz), jnp.float32, -lim2, lim2)
        b2 = jax.random.uniform(k4, (hsz,), jnp.float32, -lim2, lim2)
        gamma = 1.0 + 0.1 * jax.random.normal(k5, (hsz,), jnp.float32)
        beta = 0.1 * jax.random.normal(k6, (hsz,), jnp.float32)
        rmean = 0.1 * jax.random.normal(k7, (hsz,), jnp.float32)
        rvar = jnp.abs(1.0 + 0.1 * jax.random.normal(k8, (hsz,), jnp.float32))
        blocks.append(dict(w1=w1, b1=b1, w2=w2, b2=b2,
                           gamma=gamma, beta=beta, rmean=rmean, rvar=rvar))
        prev = hsz
    key, k1, k2 = jax.random.split(key, 3)
    lim = 1.0 / (prev ** 0.5)
    w_out = jax.random.uniform(k1, (prev, 1), jnp.float32, -lim, lim)
    b_out = jax.random.uniform(k2, (1,), jnp.float32, -lim, lim)
    return blocks, (w_out, b_out)


def fold_and_pack(blocks, out_params, input_dim):
    """Fold eval-mode BN into the second Linear of each block and pack:
         weights   : list of 2*nb bf16 matrices, each padded to its OWN
                     (round_up(in,128), round_up(out,128)) -- no uniform max pad.
         bias_slab : (2*nb + 2, Pmax) f32 rows = [b1_0, b2'_0, ..., w_out, b_out].
       Padding is zeros, which is exactly preserved through matmul/bias/ReLU, so the
       result matches the unpadded computation."""
    nb = len(blocks)
    weights = []
    rows = []
    pmax = LANE
    for blk in blocks:
        w1, b1 = blk["w1"], blk["b1"]
        scale = blk["gamma"] * jax.lax.rsqrt(blk["rvar"] + BN_EPS)
        w2 = blk["w2"] * scale[None, :]
        b2 = (blk["b2"] - blk["rmean"]) * scale + blk["beta"]
        pin = max(LANE, _round_up(w1.shape[0], LANE))
        pout = max(LANE, _round_up(w1.shape[1], LANE))
        pmax = max(pmax, pout)
        w1p = jnp.zeros((pin, pout), jnp.float32).at[:w1.shape[0], :w1.shape[1]].set(w1)
        w2p = jnp.zeros((pout, pout), jnp.float32).at[:w2.shape[0], :w2.shape[1]].set(w2)
        weights += [w1p.astype(jnp.bfloat16), w2p.astype(jnp.bfloat16)]
        rows.append((b1, b2))

    bias_slab = jnp.zeros((2 * nb + 2, pmax), jnp.float32)
    for i, (b1, b2) in enumerate(rows):
        bias_slab = bias_slab.at[2 * i, :b1.shape[0]].set(b1)
        bias_slab = bias_slab.at[2 * i + 1, :b2.shape[0]].set(b2)
    w_out, b_out = out_params
    bias_slab = bias_slab.at[2 * nb, :w_out.shape[0]].set(w_out[:, 0])
    bias_slab = bias_slab.at[2 * nb + 1, 0].set(b_out[0])
    return weights, bias_slab


# ---------------------------------------------------------------------------- call
def baseball_forward(x, weights, bias_slab, *, max_batch_tile=256):
    """Run the fused MLP kernel.  Batch is tiled on a 1-D 'parallel' grid; each
    per-layer-padded weight is its own whole-array block (constant index_map ->
    resident in VMEM, fetched once)."""
    num_blocks = len(weights) // 2
    B, D = x.shape
    Dp = weights[0].shape[0]          # = round_up(D, 128): padded input width
    p_last = weights[-1].shape[1]     # padded width of last hidden layer
    pmax = bias_slab.shape[1]

    # Balanced batch tiling: minimize last-tile padding, and keep >= 2 tiles for
    # B >= 16 so the parallel axis can shard across both v7x TensorCores.
    n_tiles = max(_cdiv(B, max_batch_tile), 2 if B >= 16 else 1)
    TB = _round_up(_cdiv(B, n_tiles), SUBLANE)
    Bp = TB * n_tiles
    x_p = jnp.zeros((Bp, Dp), jnp.float32).at[:B, :D].set(x.astype(jnp.float32))

    # Cost / VMEM accounting from actual packed sizes.
    mxu_macs = sum(int(w.size) for w in weights)                 # per-sample MACs
    flops = int(2 * Bp * mxu_macs + 2 * Bp * p_last)
    weight_bytes = sum(int(w.size) * w.dtype.itemsize for w in weights)
    bytes_accessed = int(weight_bytes + int(bias_slab.size) * 4
                         + int(x_p.size) * 4 + Bp * 4)
    # Default pipelining double-buffers every input (even constant-index weights).
    vmem_need = (2 * weight_bytes + 2 * int(bias_slab.size) * 4
                 + 2 * TB * Dp * 4 + 2 * TB * 4                  # x / out tiles
                 + 4 * TB * pmax * 4)                            # live activations
    # Cap at 64 MiB (v7x physical per-TC VMEM); v5e/v6e have 128 MiB of headroom.
    vmem_limit = int(min(max(vmem_need + (8 << 20), 32 << 20), 64 << 20))

    weight_specs = [pl.BlockSpec(w.shape, lambda i: (0, 0)) for w in weights]

    out = pl.pallas_call(
        partial(_mlp_kernel, num_blocks),
        out_shape=jax.ShapeDtypeStruct((Bp, 1), jnp.float32),
        grid=(n_tiles,),
        in_specs=([pl.BlockSpec((TB, Dp), lambda i: (i, 0))]        # x tile
                  + weight_specs                                    # resident weights
                  + [pl.BlockSpec(bias_slab.shape, lambda i: (0, 0))]),
        out_specs=pl.BlockSpec((TB, 1), lambda i: (i, 0)),
        compiler_params=pltpu.CompilerParams(
            dimension_semantics=("parallel",),
            vmem_limit_bytes=vmem_limit,
        ),
        cost_estimate=pl.CostEstimate(flops=flops, transcendentals=0,
                                      bytes_accessed=bytes_accessed),
    )(x_p, *weights, bias_slab)
    return out[:B]


# ----------------------------------------------------------------------- reference
def reference_forward(x, blocks, out_params):
    """Pure-JAX f32 reference with UNFOLDED BN (eval mode, running stats) — matches
    the PyTorch module's forward semantics."""
    h = x.astype(jnp.float32)
    for blk in blocks:
        h = jnp.maximum(h @ blk["w1"] + blk["b1"], 0.0)
        h = h @ blk["w2"] + blk["b2"]
        h = (h - blk["rmean"]) / jnp.sqrt(blk["rvar"] + BN_EPS) * blk["gamma"] + blk["beta"]
        h = jnp.maximum(h, 0.0)   # Dropout is identity in eval mode
    w_out, b_out = out_params
    return h @ w_out + b_out


if __name__ == "__main__":
    # input_dim = len(args.input_args) - 1 ; pick a small synthetic size.
    INPUT_DIM = 8
    BATCH = 16

    key = jax.random.PRNGKey(0)
    pkey, xkey = jax.random.split(key)
    blocks, out_params = init_params(pkey, INPUT_DIM)
    weights, bias_slab = fold_and_pack(blocks, out_params, INPUT_DIM)
    x = jax.random.normal(xkey, (BATCH, INPUT_DIM), jnp.float32)

    out = baseball_forward(x, weights, bias_slab)
    out = jax.block_until_ready(out)

    ref = reference_forward(x, blocks, out_params)
    assert out.shape == (BATCH, 1)
    # bf16 matmul operands (f32 accumulate) -> relaxed tolerance vs f32 reference.
    assert jnp.allclose(out, ref, atol=5e-2, rtol=5e-2), "mismatch vs JAX reference"

    print("KERNEL_OK")
</pallas_src>

<mosaic_0001>
module attributes {stable_mosaic.version = 11 : i64} {
  func.func @_mlp_kernel(%arg0: i32, %arg1: memref<8x128xf32, #tpu.memory_space<vmem>>, %arg2: memref<128x128xbf16, #tpu.memory_space<vmem>>, %arg3: memref<128x128xbf16, #tpu.memory_space<vmem>>, %arg4: memref<128x128xbf16, #tpu.memory_space<vmem>>, %arg5: memref<128x128xbf16, #tpu.memory_space<vmem>>, %arg6: memref<128x128xbf16, #tpu.memory_space<vmem>>, %arg7: memref<128x128xbf16, #tpu.memory_space<vmem>>, %arg8: memref<128x128xbf16, #tpu.memory_space<vmem>>, %arg9: memref<128x128xbf16, #tpu.memory_space<vmem>>, %arg10: memref<128x128xbf16, #tpu.memory_space<vmem>>, %arg11: memref<128x128xbf16, #tpu.memory_space<vmem>>, %arg12: memref<128x128xbf16, #tpu.memory_space<vmem>>, %arg13: memref<128x128xbf16, #tpu.memory_space<vmem>>, %arg14: memref<128x128xbf16, #tpu.memory_space<vmem>>, %arg15: memref<128x128xbf16, #tpu.memory_space<vmem>>, %arg16: memref<128x128xbf16, #tpu.memory_space<vmem>>, %arg17: memref<128x128xbf16, #tpu.memory_space<vmem>>, %arg18: memref<18x128xf32, #tpu.memory_space<vmem>>, %arg19: memref<8x1xf32, #tpu.memory_space<vmem>>) attributes {dimension_semantics = [#tpu.dimension_semantics<parallel>], iteration_bounds = array<i64: 2>, scalar_prefetch = 0 : i64, scratch_operands = 0 : i64, tpu.core_type = #tpu.core_type<tc>, window_params = [{transform_indices = @transform_0, window_bounds = array<i64: 8, 128>}, {pipeline_mode = #tpu.pipeline_mode<synchronous>, transform_indices = @transform_1, window_bounds = array<i64: 128, 128>}, {pipeline_mode = #tpu.pipeline_mode<synchronous>, transform_indices = @transform_2, window_bounds = array<i64: 128, 128>}, {pipeline_mode = #tpu.pipeline_mode<synchronous>, transform_indices = @transform_3, window_bounds = array<i64: 128, 128>}, {pipeline_mode = #tpu.pipeline_mode<synchronous>, transform_indices = @transform_4, window_bounds = array<i64: 128, 128>}, {pipeline_mode = #tpu.pipeline_mode<synchronous>, transform_indices = @transform_5, window_bounds = array<i64: 128, 128>}, {pipeline_mode = #tpu.pipeline_mode<synchronous>, transform_indices = @transform_6, window_bounds = array<i64: 128, 128>}, {pipeline_mode = #tpu.pipeline_mode<synchronous>, transform_indices = @transform_7, window_bounds = array<i64: 128, 128>}, {pipeline_mode = #tpu.pipeline_mode<synchronous>, transform_indices = @transform_8, window_bounds = array<i64: 128, 128>}, {pipeline_mode = #tpu.pipeline_mode<synchronous>, transform_indices = @transform_9, window_bounds = array<i64: 128, 128>}, {pipeline_mode = #tpu.pipeline_mode<synchronous>, transform_indices = @transform_10, window_bounds = array<i64: 128, 128>}, {pipeline_mode = #tpu.pipeline_mode<synchronous>, transform_indices = @transform_11, window_bounds = array<i64: 128, 128>}, {pipeline_mode = #tpu.pipeline_mode<synchronous>, transform_indices = @transform_12, window_bounds = array<i64: 128, 128>}, {pipeline_mode = #tpu.pipeline_mode<synchronous>, transform_indices = @transform_13, window_bounds = array<i64: 128, 128>}, {pipeline_mode = #tpu.pipeline_mode<synchronous>, transform_indices = @transform_14, window_bounds = array<i64: 128, 128>}, {pipeline_mode = #tpu.pipeline_mode<synchronous>, transform_indices = @transform_15, window_bounds = array<i64: 128, 128>}, {pipeline_mode = #tpu.pipeline_mode<synchronous>, transform_indices = @transform_16, window_bounds = array<i64: 128, 128>}, {pipeline_mode = #tpu.pipeline_mode<synchronous>, transform_indices = @transform_17, window_bounds = array<i64: 18, 128>}, {transform_indices = @transform_18, window_bounds = array<i64: 8, 1>}]} {
    %c0 = arith.constant 0 : index
    %c0_0 = arith.constant 0 : index
    %0 = vector.load %arg1[%c0, %c0_0] : memref<8x128xf32, #tpu.memory_space<vmem>>, vector<8x128xf32>
    %c0_1 = arith.constant 0 : index
    %c0_2 = arith.constant 0 : index
    %1 = vector.load %arg2[%c0_1, %c0_2] : memref<128x128xbf16, #tpu.memory_space<vmem>>, vector<128x128xbf16>
    %c0_3 = arith.constant 0 : index
    %c0_4 = arith.constant 0 : index
    %2 = vector.load %arg3[%c0_3, %c0_4] : memref<128x128xbf16, #tpu.memory_space<vmem>>, vector<128x128xbf16>
    %c0_5 = arith.constant 0 : index
    %c0_6 = arith.constant 0 : index
    %3 = vector.load %arg18[%c0_5, %c0_6] : memref<18x128xf32, #tpu.memory_space<vmem>>, vector<1x128xf32>
    %c1 = arith.constant 1 : index
    %c0_7 = arith.constant 0 : index
    %4 = vector.load %arg18[%c1, %c0_7] : memref<18x128xf32, #tpu.memory_space<vmem>>, vector<1x128xf32>
    %5 = arith.truncf %0 : vector<8x128xf32> to vector<8x128xbf16>
    %cst = arith.constant dense<0.000000e+00> : vector<8x128xf32>
    %6 = tpu.matmul %5, %1, %cst {dimension_numbers = #tpu.dot_dimension_numbers<[1], [0], [0], [1], [0, 0, 1, 1], [], []>} : vector<8x128xbf16>, vector<128x128xbf16>, vector<8x128xf32> -> vector<8x128xf32>
    %7 = vector.broadcast %3 : vector<1x128xf32> to vector<8x128xf32>
    %8 = arith.addf %6, %7 : vector<8x128xf32>
    %cst_8 = arith.constant 0.000000e+00 : f32
    %9 = vector.broadcast %cst_8 : f32 to vector<8x128xf32>
    %10 = arith.maximumf %8, %9 : vector<8x128xf32>
    %11 = arith.truncf %10 : vector<8x128xf32> to vector<8x128xbf16>
    %cst_9 = arith.constant dense<0.000000e+00> : vector<8x128xf32>
    %12 = tpu.matmul %11, %2, %cst_9 {dimension_numbers = #tpu.dot_dimension_numbers<[1], [0], [0], [1], [0, 0, 1, 1], [], []>} : vector<8x128xbf16>, vector<128x128xbf16>, vector<8x128xf32> -> vector<8x128xf32>
    %13 = vector.broadcast %4 : vector<1x128xf32> to vector<8x128xf32>
    %14 = arith.addf %12, %13 : vector<8x128xf32>
    %cst_10 = arith.constant 0.000000e+00 : f32
    %15 = vector.broadcast %cst_10 : f32 to vector<8x128xf32>
    %16 = arith.maximumf %14, %15 : vector<8x128xf32>
    %c0_11 = arith.constant 0 : index
    %c0_12 = arith.constant 0 : index
    %17 = vector.load %arg4[%c0_11, %c0_12] : memref<128x128xbf16, #tpu.memory_space<vmem>>, vector<128x128xbf16>
    %c0_13 = arith.constant 0 : index
    %c0_14 = arith.constant 0 : index
    %18 = vector.load %arg5[%c0_13, %c0_14] : memref<128x128xbf16, #tpu.memory_space<vmem>>, vector<128x128xbf16>
    %c2 = arith.constant 2 : index
    %c0_15 = arith.constant 0 : index
    %19 = vector.load %arg18[%c2, %c0_15] : memref<18x128xf32, #tpu.memory_space<vmem>>, vector<1x128xf32>
    %c3 = arith.constant 3 : index
    %c0_16 = arith.constant 0 : index
    %20 = vector.load %arg18[%c3, %c0_16] : memref<18x128xf32, #tpu.memory_space<vmem>>, vector<1x128xf32>
    %21 = arith.truncf %16 : vector<8x128xf32> to vector<8x128xbf16>
    %cst_17 = arith.constant dense<0.000000e+00> : vector<8x128xf32>
    %22 = tpu.matmul %21, %17, %cst_17 {dimension_numbers = #tpu.dot_dimension_numbers<[1], [0], [0], [1], [0, 0, 1, 1], [], []>} : vector<8x128xbf16>, vector<128x128xbf16>, vector<8x128xf32> -> vector<8x128xf32>
    %23 = vector.broadcast %19 : vector<1x128xf32> to vector<8x128xf32>
    %24 = arith.addf %22, %23 : vector<8x128xf32>
    %cst_18 = arith.constant 0.000000e+00 : f32
    %25 = vector.broadcast %cst_18 : f32 to vector<8x128xf32>
    %26 = arith.maximumf %24, %25 : vector<8x128xf32>
    %27 = arith.truncf %26 : vector<8x128xf32> to vector<8x128xbf16>
    %cst_19 = arith.constant dense<0.000000e+00> : vector<8x128xf32>
    %28 = tpu.matmul %27, %18, %cst_19 {dimension_numbers = #tpu.dot_dimension_numbers<[1], [0], [0], [1], [0, 0, 1, 1], [], []>} : vector<8x128xbf16>, vector<128x128xbf16>, vector<8x128xf32> -> vector<8x128xf32>
    %29 = vector.broadcast %20 : vector<1x128xf32> to vector<8x128xf32>
    %30 = arith.addf %28, %29 : vector<8x128xf32>
    %cst_20 = arith.constant 0.000000e+00 : f32
    %31 = vector.broadcast %cst_20 : f32 to vector<8x128xf32>
    %32 = arith.maximumf %30, %31 : vector<8x128xf32>
    %c0_21 = arith.constant 0 : index
    %c0_22 = arith.constant 0 : index
    %33 = vector.load %arg6[%c0_21, %c0_22] : memref<128x128xbf16, #tpu.memory_space<vmem>>, vector<128x128xbf16>
    %c0_23 = arith.constant 0 : index
    %c0_24 = arith.constant 0 : index
    %34 = vector.load %arg7[%c0_23, %c0_24] : memref<128x128xbf16, #tpu.memory_space<vmem>>, vector<128x128xbf16>
    %c4 = arith.constant 4 : index
    %c0_25 = arith.constant 0 : index
    %35 = vector.load %arg18[%c4, %c0_25] : memref<18x128xf32, #tpu.memory_space<vmem>>, vector<1x128xf32>
    %c5 = arith.constant 5 : index
    %c0_26 = arith.constant 0 : index
    %36 = vector.load %arg18[%c5, %c0_26] : memref<18x128xf32, #tpu.memory_space<vmem>>, vector<1x128xf32>
    %37 = arith.truncf %32 : vector<8x128xf32> to vector<8x128xbf16>
    %cst_27 = arith.constant dense<0.000000e+00> : vector<8x128xf32>
    %38 = tpu.matmul %37, %33, %cst_27 {dimension_numbers = #tpu.dot_dimension_numbers<[1], [0], [0], [1], [0, 0, 1, 1], [], []>} : vector<8x128xbf16>, vector<128x128xbf16>, vector<8x128xf32> -> vector<8x128xf32>
    %39 = vector.broadcast %35 : vector<1x128xf32> to vector<8x128xf32>
    %40 = arith.addf %38, %39 : vector<8x128xf32>
    %cst_28 = arith.constant 0.000000e+00 : f32
    %41 = vector.broadcast %cst_28 : f32 to vector<8x128xf32>
    %42 = arith.maximumf %40, %41 : vector<8x128xf32>
    %43 = arith.truncf %42 : vector<8x128xf32> to vector<8x128xbf16>
    %cst_29 = arith.constant dense<0.000000e+00> : vector<8x128xf32>
    %44 = tpu.matmul %43, %34, %cst_29 {dimension_numbers = #tpu.dot_dimension_numbers<[1], [0], [0], [1], [0, 0, 1, 1], [], []>} : vector<8x128xbf16>, vector<128x128xbf16>, vector<8x128xf32> -> vector<8x128xf32>
    %45 = vector.broadcast %36 : vector<1x128xf32> to vector<8x128xf32>
    %46 = arith.addf %44, %45 : vector<8x128xf32>
    %cst_30 = arith.constant 0.000000e+00 : f32
    %47 = vector.broadcast %cst_30 : f32 to vector<8x128xf32>
    %48 = arith.maximumf %46, %47 : vector<8x128xf32>
    %c0_31 = arith.constant 0 : index
    %c0_32 = arith.constant 0 : index
    %49 = vector.load %arg8[%c0_31, %c0_32] : memref<128x128xbf16, #tpu.memory_space<vmem>>, vector<128x128xbf16>
    %c0_33 = arith.constant 0 : index
    %c0_34 = arith.constant 0 : index
    %50 = vector.load %arg9[%c0_33, %c0_34] : memref<128x128xbf16, #tpu.memory_space<vmem>>, vector<128x128xbf16>
    %c6 = arith.constant 6 : index
    %c0_35 = arith.constant 0 : index
    %51 = vector.load %arg18[%c6, %c0_35] : memref<18x128xf32, #tpu.memory_space<vmem>>, vector<1x128xf32>
    %c7 = arith.constant 7 : index
    %c0_36 = arith.constant 0 : index
    %52 = vector.load %arg18[%c7, %c0_36] : memref<18x128xf32, #tpu.memory_space<vmem>>, vector<1x128xf32>
    %53 = arith.truncf %48 : vector<8x128xf32> to vector<8x128xbf16>
    %cst_37 = arith.constant dense<0.000000e+00> : vector<8x128xf32>
    %54 = tpu.matmul %53, %49, %cst_37 {dimension_numbers = #tpu.dot_dimension_numbers<[1], [0], [0], [1], [0, 0, 1, 1], [], []>} : vector<8x128xbf16>, vector<128x128xbf16>, vector<8x128xf32> -> vector<8x128xf32>
    %55 = vector.broadcast %51 : vector<1x128xf32> to vector<8x128xf32>
    %56 = arith.addf %54, %55 : vector<8x128xf32>
    %cst_38 = arith.constant 0.000000e+00 : f32
    %57 = vector.broadcast %cst_38 : f32 to vector<8x128xf32>
    %58 = arith.maximumf %56, %57 : vector<8x128xf32>
    %59 = arith.truncf %58 : vector<8x128xf32> to vector<8x128xbf16>
    %cst_39 = arith.constant dense<0.000000e+00> : vector<8x128xf32>
    %60 = tpu.matmul %59, %50, %cst_39 {dimension_numbers = #tpu.dot_dimension_numbers<[1], [0], [0], [1], [0, 0, 1, 1], [], []>} : vector<8x128xbf16>, vector<128x128xbf16>, vector<8x128xf32> -> vector<8x128xf32>
    %61 = vector.broadcast %52 : vector<1x128xf32> to vector<8x128xf32>
    %62 = arith.addf %60, %61 : vector<8x128xf32>
    %cst_40 = arith.constant 0.000000e+00 : f32
    %63 = vector.broadcast %cst_40 : f32 to vector<8x128xf32>
    %64 = arith.maximumf %62, %63 : vector<8x128xf32>
    %c0_41 = arith.constant 0 : index
    %c0_42 = arith.constant 0 : index
    %65 = vector.load %arg10[%c0_41, %c0_42] : memref<128x128xbf16, #tpu.memory_space<vmem>>, vector<128x128xbf16>
    %c0_43 = arith.constant 0 : index
    %c0_44 = arith.constant 0 : index
    %66 = vector.load %arg11[%c0_43, %c0_44] : memref<128x128xbf16, #tpu.memory_space<vmem>>, vector<128x128xbf16>
    %c8 = arith.constant 8 : index
    %c0_45 = arith.constant 0 : index
    %67 = vector.load %arg18[%c8, %c0_45] : memref<18x128xf32, #tpu.memory_space<vmem>>, vector<1x128xf32>
    %c9 = arith.constant 9 : index
    %c0_46 = arith.constant 0 : index
    %68 = vector.load %arg18[%c9, %c0_46] : memref<18x128xf32, #tpu.memory_space<vmem>>, vector<1x128xf32>
    %69 = arith.truncf %64 : vector<8x128xf32> to vector<8x128xbf16>
    %cst_47 = arith.constant dense<0.000000e+00> : vector<8x128xf32>
    %70 = tpu.matmul %69, %65, %cst_47 {dimension_numbers = #tpu.dot_dimension_numbers<[1], [0], [0], [1], [0, 0, 1, 1], [], []>} : vector<8x128xbf16>, vector<128x128xbf16>, vector<8x128xf32> -> vector<8x128xf32>
    %71 = vector.broadcast %67 : vector<1x128xf32> to vector<8x128xf32>
    %72 = arith.addf %70, %71 : vector<8x128xf32>
    %cst_48 = arith.constant 0.000000e+00 : f32
    %73 = vector.broadcast %cst_48 : f32 to vector<8x128xf32>
    %74 = arith.maximumf %72, %73 : vector<8x128xf32>
    %75 = arith.truncf %74 : vector<8x128xf32> to vector<8x128xbf16>
    %cst_49 = arith.constant dense<0.000000e+00> : vector<8x128xf32>
    %76 = tpu.matmul %75, %66, %cst_49 {dimension_numbers = #tpu.dot_dimension_numbers<[1], [0], [0], [1], [0, 0, 1, 1], [], []>} : vector<8x128xbf16>, vector<128x128xbf16>, vector<8x128xf32> -> vector<8x128xf32>
    %77 = vector.broadcast %68 : vector<1x128xf32> to vector<8x128xf32>
    %78 = arith.addf %76, %77 : vector<8x128xf32>
    %cst_50 = arith.constant 0.000000e+00 : f32
    %79 = vector.broadcast %cst_50 : f32 to vector<8x128xf32>
    %80 = arith.maximumf %78, %79 : vector<8x128xf32>
    %c0_51 = arith.constant 0 : index
    %c0_52 = arith.constant 0 : index
    %81 = vector.load %arg12[%c0_51, %c0_52] : memref<128x128xbf16, #tpu.memory_space<vmem>>, vector<128x128xbf16>
    %c0_53 = arith.constant 0 : index
    %c0_54 = arith.constant 0 : index
    %82 = vector.load %arg13[%c0_53, %c0_54] : memref<128x128xbf16, #tpu.memory_space<vmem>>, vector<128x128xbf16>
    %c10 = arith.constant 10 : index
    %c0_55 = arith.constant 0 : index
    %83 = vector.load %arg18[%c10, %c0_55] : memref<18x128xf32, #tpu.memory_space<vmem>>, vector<1x128xf32>
    %c11 = arith.constant 11 : index
    %c0_56 = arith.constant 0 : index
    %84 = vector.load %arg18[%c11, %c0_56] : memref<18x128xf32, #tpu.memory_space<vmem>>, vector<1x128xf32>
    %85 = arith.truncf %80 : vector<8x128xf32> to vector<8x128xbf16>
    %cst_57 = arith.constant dense<0.000000e+00> : vector<8x128xf32>
    %86 = tpu.matmul %85, %81, %cst_57 {dimension_numbers = #tpu.dot_dimension_numbers<[1], [0], [0], [1], [0, 0, 1, 1], [], []>} : vector<8x128xbf16>, vector<128x128xbf16>, vector<8x128xf32> -> vector<8x128xf32>
    %87 = vector.broadcast %83 : vector<1x128xf32> to vector<8x128xf32>
    %88 = arith.addf %86, %87 : vector<8x128xf32>
    %cst_58 = arith.constant 0.000000e+00 : f32
    %89 = vector.broadcast %cst_58 : f32 to vector<8x128xf32>
    %90 = arith.maximumf %88, %89 : vector<8x128xf32>
    %91 = arith.truncf %90 : vector<8x128xf32> to vector<8x128xbf16>
    %cst_59 = arith.constant dense<0.000000e+00> : vector<8x128xf32>
    %92 = tpu.matmul %91, %82, %cst_59 {dimension_numbers = #tpu.dot_dimension_numbers<[1], [0], [0], [1], [0, 0, 1, 1], [], []>} : vector<8x128xbf16>, vector<128x128xbf16>, vector<8x128xf32> -> vector<8x128xf32>
    %93 = vector.broadcast %84 : vector<1x128xf32> to vector<8x128xf32>
    %94 = arith.addf %92, %93 : vector<8x128xf32>
    %cst_60 = arith.constant 0.000000e+00 : f32
    %95 = vector.broadcast %cst_60 : f32 to vector<8x128xf32>
    %96 = arith.maximumf %94, %95 : vector<8x128xf32>
    %c0_61 = arith.constant 0 : index
    %c0_62 = arith.constant 0 : index
    %97 = vector.load %arg14[%c0_61, %c0_62] : memref<128x128xbf16, #tpu.memory_space<vmem>>, vector<128x128xbf16>
    %c0_63 = arith.constant 0 : index
    %c0_64 = arith.constant 0 : index
    %98 = vector.load %arg15[%c0_63, %c0_64] : memref<128x128xbf16, #tpu.memory_space<vmem>>, vector<128x128xbf16>
    %c12 = arith.constant 12 : index
    %c0_65 = arith.constant 0 : index
    %99 = vector.load %arg18[%c12, %c0_65] : memref<18x128xf32, #tpu.memory_space<vmem>>, vector<1x128xf32>
    %c13 = arith.constant 13 : index
    %c0_66 = arith.constant 0 : index
    %100 = vector.load %arg18[%c13, %c0_66] : memref<18x128xf32, #tpu.memory_space<vmem>>, vector<1x128xf32>
    %101 = arith.truncf %96 : vector<8x128xf32> to vector<8x128xbf16>
    %cst_67 = arith.constant dense<0.000000e+00> : vector<8x128xf32>
    %102 = tpu.matmul %101, %97, %cst_67 {dimension_numbers = #tpu.dot_dimension_numbers<[1], [0], [0], [1], [0, 0, 1, 1], [], []>} : vector<8x128xbf16>, vector<128x128xbf16>, vector<8x128xf32> -> vector<8x128xf32>
    %103 = vector.broadcast %99 : vector<1x128xf32> to vector<8x128xf32>
    %104 = arith.addf %102, %103 : vector<8x128xf32>
    %cst_68 = arith.constant 0.000000e+00 : f32
    %105 = vector.broadcast %cst_68 : f32 to vector<8x128xf32>
    %106 = arith.maximumf %104, %105 : vector<8x128xf32>
    %107 = arith.truncf %106 : vector<8x128xf32> to vector<8x128xbf16>
    %cst_69 = arith.constant dense<0.000000e+00> : vector<8x128xf32>
    %108 = tpu.matmul %107, %98, %cst_69 {dimension_numbers = #tpu.dot_dimension_numbers<[1], [0], [0], [1], [0, 0, 1, 1], [], []>} : vector<8x128xbf16>, vector<128x128xbf16>, vector<8x128xf32> -> vector<8x128xf32>
    %109 = vector.broadcast %100 : vector<1x128xf32> to vector<8x128xf32>
    %110 = arith.addf %108, %109 : vector<8x128xf32>
    %cst_70 = arith.constant 0.000000e+00 : f32
    %111 = vector.broadcast %cst_70 : f32 to vector<8x128xf32>
    %112 = arith.maximumf %110, %111 : vector<8x128xf32>
    %c0_71 = arith.constant 0 : index
    %c0_72 = arith.constant 0 : index
    %113 = vector.load %arg16[%c0_71, %c0_72] : memref<128x128xbf16, #tpu.memory_space<vmem>>, vector<128x128xbf16>
    %c0_73 = arith.constant 0 : index
    %c0_74 = arith.constant 0 : index
    %114 = vector.load %arg17[%c0_73, %c0_74] : memref<128x128xbf16, #tpu.memory_space<vmem>>, vector<128x128xbf16>
    %c14 = arith.constant 14 : index
    %c0_75 = arith.constant 0 : index
    %115 = vector.load %arg18[%c14, %c0_75] : memref<18x128xf32, #tpu.memory_space<vmem>>, vector<1x128xf32>
    %c15 = arith.constant 15 : index
    %c0_76 = arith.constant 0 : index
    %116 = vector.load %arg18[%c15, %c0_76] : memref<18x128xf32, #tpu.memory_space<vmem>>, vector<1x128xf32>
    %117 = arith.truncf %112 : vector<8x128xf32> to vector<8x128xbf16>
    %cst_77 = arith.constant dense<0.000000e+00> : vector<8x128xf32>
    %118 = tpu.matmul %117, %113, %cst_77 {dimension_numbers = #tpu.dot_dimension_numbers<[1], [0], [0], [1], [0, 0, 1, 1], [], []>} : vector<8x128xbf16>, vector<128x128xbf16>, vector<8x128xf32> -> vector<8x128xf32>
    %119 = vector.broadcast %115 : vector<1x128xf32> to vector<8x128xf32>
    %120 = arith.addf %118, %119 : vector<8x128xf32>
    %cst_78 = arith.constant 0.000000e+00 : f32
    %121 = vector.broadcast %cst_78 : f32 to vector<8x128xf32>
    %122 = arith.maximumf %120, %121 : vector<8x128xf32>
    %123 = arith.truncf %122 : vector<8x128xf32> to vector<8x128xbf16>
    %cst_79 = arith.constant dense<0.000000e+00> : vector<8x128xf32>
    %124 = tpu.matmul %123, %114, %cst_79 {dimension_numbers = #tpu.dot_dimension_numbers<[1], [0], [0], [1], [0, 0, 1, 1], [], []>} : vector<8x128xbf16>, vector<128x128xbf16>, vector<8x128xf32> -> vector<8x128xf32>
    %125 = vector.broadcast %116 : vector<1x128xf32> to vector<8x128xf32>
    %126 = arith.addf %124, %125 : vector<8x128xf32>
    %cst_80 = arith.constant 0.000000e+00 : f32
    %127 = vector.broadcast %cst_80 : f32 to vector<8x128xf32>
    %128 = arith.maximumf %126, %127 : vector<8x128xf32>
    %c16 = arith.constant 16 : index
    %c0_81 = arith.constant 0 : index
    %129 = vector.load %arg18[%c16, %c0_81] : memref<18x128xf32, #tpu.memory_space<vmem>>, vector<1x128xf32>
    %c17 = arith.constant 17 : index
    %c0_82 = arith.constant 0 : index
    %130 = vector.load %arg18[%c17, %c0_82] : memref<18x128xf32, #tpu.memory_space<vmem>>, vector<1x1xf32>
    %131 = vector.broadcast %129 : vector<1x128xf32> to vector<8x128xf32>
    %132 = arith.mulf %128, %131 : vector<8x128xf32>
    %cst_83 = arith.constant dense<0.000000e+00> : vector<8xf32>
    %133 = vector.multi_reduction <add>, %132, %cst_83 [1] : vector<8x128xf32> to vector<8xf32>
    %134 = vector.shape_cast %133 : vector<8xf32> to vector<8x1xf32>
    %135 = vector.broadcast %130 : vector<1x1xf32> to vector<8x1xf32>
    %136 = arith.addf %134, %135 : vector<8x1xf32>
    %c0_84 = arith.constant 0 : index
    %c0_85 = arith.constant 0 : index
    %137 = vector.load %arg19[%c0_84, %c0_85] : memref<8x1xf32, #tpu.memory_space<vmem>>, vector<8x1xf32>
    tpu.vector_store %arg19[%c0_84, %c0_85], %136 {strides = array<i32>} : memref<8x1xf32, #tpu.memory_space<vmem>>, vector<8x1xf32>,
    return
  }
  func.func @transform_0(%arg0: i32) -> (i32, i32) {
    %c0_i32 = arith.constant 0 : i32
    %c0_i32_0 = arith.constant 0 : i32
    return %arg0, %c0_i32 : i32, i32
  }
  func.func @transform_1(%arg0: i32) -> (i32, i32) {
    %c0_i32 = arith.constant 0 : i32
    %c0_i32_0 = arith.constant 0 : i32
    %c0_i32_1 = arith.constant 0 : i32
    return %c0_i32, %c0_i32_0 : i32, i32
  }
  func.func @transform_2(%arg0: i32) -> (i32, i32) {
    %c0_i32 = arith.constant 0 : i32
    %c0_i32_0 = arith.constant 0 : i32
    %c0_i32_1 = arith.constant 0 : i32
    return %c0_i32, %c0_i32_0 : i32, i32
  }
  func.func @transform_3(%arg0: i32) -> (i32, i32) {
    %c0_i32 = arith.constant 0 : i32
    %c0_i32_0 = arith.constant 0 : i32
    %c0_i32_1 = arith.constant 0 : i32
    return %c0_i32, %c0_i32_0 : i32, i32
  }
  func.func @transform_4(%arg0: i32) -> (i32, i32) {
    %c0_i32 = arith.constant 0 : i32
    %c0_i32_0 = arith.constant 0 : i32
    %c0_i32_1 = arith.constant 0 : i32
    return %c0_i32, %c0_i32_0 : i32, i32
  }
  func.func @transform_5(%arg0: i32) -> (i32, i32) {
    %c0_i32 = arith.constant 0 : i32
    %c0_i32_0 = arith.constant 0 : i32
    %c0_i32_1 = arith.constant 0 : i32
    return %c0_i32, %c0_i32_0 : i32, i32
  }
  func.func @transform_6(%arg0: i32) -> (i32, i32) {
    %c0_i32 = arith.constant 0 : i32
    %c0_i32_0 = arith.constant 0 : i32
    %c0_i32_1 = arith.constant 0 : i32
    return %c0_i32, %c0_i32_0 : i32, i32
  }
  func.func @transform_7(%arg0: i32) -> (i32, i32) {
    %c0_i32 = arith.constant 0 : i32
    %c0_i32_0 = arith.constant 0 : i32
    %c0_i32_1 = arith.constant 0 : i32
    return %c0_i32, %c0_i32_0 : i32, i32
  }
  func.func @transform_8(%arg0: i32) -> (i32, i32) {
    %c0_i32 = arith.constant 0 : i32
    %c0_i32_0 = arith.constant 0 : i32
    %c0_i32_1 = arith.constant 0 : i32
    return %c0_i32, %c0_i32_0 : i32, i32
  }
  func.func @transform_9(%arg0: i32) -> (i32, i32) {
    %c0_i32 = arith.constant 0 : i32
    %c0_i32_0 = arith.constant 0 : i32
    %c0_i32_1 = arith.constant 0 : i32
    return %c0_i32, %c0_i32_0 : i32, i32
  }
  func.func @transform_10(%arg0: i32) -> (i32, i32) {
    %c0_i32 = arith.constant 0 : i32
    %c0_i32_0 = arith.constant 0 : i32
    %c0_i32_1 = arith.constant 0 : i32
    return %c0_i32, %c0_i32_0 : i32, i32
  }
  func.func @transform_11(%arg0: i32) -> (i32, i32) {
    %c0_i32 = arith.constant 0 : i32
    %c0_i32_0 = arith.constant 0 : i32
    %c0_i32_1 = arith.constant 0 : i32
    return %c0_i32, %c0_i32_0 : i32, i32
  }
  func.func @transform_12(%arg0: i32) -> (i32, i32) {
    %c0_i32 = arith.constant 0 : i32
    %c0_i32_0 = arith.constant 0 : i32
    %c0_i32_1 = arith.constant 0 : i32
    return %c0_i32, %c0_i32_0 : i32, i32
  }
  func.func @transform_13(%arg0: i32) -> (i32, i32) {
    %c0_i32 = arith.constant 0 : i32
    %c0_i32_0 = arith.constant 0 : i32
    %c0_i32_1 = arith.constant 0 : i32
    return %c0_i32, %c0_i32_0 : i32, i32
  }
  func.func @transform_14(%arg0: i32) -> (i32, i32) {
    %c0_i32 = arith.constant 0 : i32
    %c0_i32_0 = arith.constant 0 : i32
    %c0_i32_1 = arith.constant 0 : i32
    return %c0_i32, %c0_i32_0 : i32, i32
  }
  func.func @transform_15(%arg0: i32) -> (i32, i32) {
    %c0_i32 = arith.constant 0 : i32
    %c0_i32_0 = arith.constant 0 : i32
    %c0_i32_1 = arith.constant 0 : i32
    return %c0_i32, %c0_i32_0 : i32, i32
  }
  func.func @transform_16(%arg0: i32) -> (i32, i32) {
    %c0_i32 = arith.constant 0 : i32
    %c0_i32_0 = arith.constant 0 : i32
    %c0_i32_1 = arith.constant 0 : i32
    return %c0_i32, %c0_i32_0 : i32, i32
  }
  func.func @transform_17(%arg0: i32) -> (i32, i32) {
    %c0_i32 = arith.constant 0 : i32
    %c0_i32_0 = arith.constant 0 : i32
    %c0_i32_1 = arith.constant 0 : i32
    return %c0_i32, %c0_i32_0 : i32, i32
  }
  func.func @transform_18(%arg0: i32) -> (i32, i32) {
    %c0_i32 = arith.constant 0 : i32
    %c0_i32_0 = arith.constant 0 : i32
    return %arg0, %c0_i32 : i32, i32
  }
}

</mosaic_0001>

<bundles_post_ra>
// kernel: tpu_custom_call.1
= control target key start
LH: loop header
LB: loop body
LE: loop exit
PB: predicated region body
PF: predicated region fallthrough
CT: control target
= control target key end

     0   :  { %s5216_s0 = inlined_call_operand.hbm [shape: f32[16,128], index: 0, kind: input, shape index: {}]   ;;  %s5217_s1 = inlined_call_operand.hbm [shape: bf16[128,128], index: 1, kind: input, shape index: {}]   ;;  %s5218_s2 = inlined_call_operand.hbm [shape: bf16[128,128], index: 2, kind: input, shape index: {}]   ;;  %s5219_s3 = inlined_call_operand.hbm [shape: bf16[128,128], index: 3, kind: input, shape index: {}]   ;;  %s5220_s4 = inlined_call_operand.hbm [shape: bf16[128,128], index: 4, kind: input, shape index: {}]   ;;  %s5221_s5 = inlined_call_operand.hbm [shape: bf16[128,128], index: 5, kind: input, shape index: {}]   ;;  %s5222_s6 = inlined_call_operand.hbm [shape: bf16[128,128], index: 6, kind: input, shape index: {}]   ;;  %s5223_s7 = inlined_call_operand.hbm [shape: bf16[128,128], index: 7, kind: input, shape index: {}]   ;;  %s5224_s8 = inlined_call_operand.hbm [shape: bf16[128,128], index: 8, kind: input, shape index: {}]   ;;  %s5225_s9 = inlined_call_operand.hbm [shape: bf16[128,128], index: 9, kind: input, shape index: {}]   ;;  %s5226_s10 = inlined_call_operand.hbm [shape: bf16[128,128], index: 10, kind: input, shape index: {}]   ;;  %s5227_s11 = inlined_call_operand.hbm [shape: bf16[128,128], index: 11, kind: input, shape index: {}]   ;;  %s5228_s12 = inlined_call_operand.hbm [shape: bf16[128,128], index: 12, kind: input, shape index: {}]   ;;  %s5229_s13 = inlined_call_operand.hbm [shape: bf16[128,128], index: 13, kind: input, shape index: {}]   ;;  %s5230_s14 = inlined_call_operand.hbm [shape: bf16[128,128], index: 14, kind: input, shape index: {}]   ;;  %s5231_s15 = inlined_call_operand.hbm [shape: bf16[128,128], index: 15, kind: input, shape index: {}]   ;;  %s5232_s16 = inlined_call_operand.hbm [shape: bf16[128,128], index: 16, kind: input, shape index: {}]   ;;  %s5233_s17 = inlined_call_operand.vmem [shape: f32[18,128], index: 17, kind: input, shape index: {}]   ;;  %s5234_s18 = inlined_call_operand.vmem [shape: f32[16,1], index: 18, kind: output, shape index: {}]  }
   0x1   :  { %5249 = sst [smem:[#allocation43_spill]] %s5216_s0 }
   0x2   :  { %5250 = sst [smem:[#allocation44_spill]] %s5217_s1 }
   0x3   :  { %5251 = sst [smem:[#allocation45_spill]] %s5218_s2 }
   0x4   :  { %5252 = sst [smem:[#allocation46_spill]] %s5219_s3 }
   0x5   :  { %5253 = sst [smem:[#allocation47_spill]] %s5233_s17 }
   0x6   :  { %5254 = sst [smem:[#allocation48_spill]] %s5234_s18 }
   0x7   :  { %23 = vsyncpa [#allocation3], 0 }
   0x8   :  { %25 = vsyncpa [#allocation3 + $0x1], 0 }
   0x9   :  { %26 = vsyncpa [#allocation5], 0 }
   0xa   :  { %27 = vsyncpa [#allocation8], 0 }
   0xb   :  { %28 = vsyncpa [#allocation11], 0 }
   0xc   :  { %29 = vsyncpa [#allocation14], 0 }
   0xd   :  { %30 = vsyncpa [#allocation17], 0 }
   0xe   :  { %31 = vsyncpa [#allocation20], 0 }
   0xf   :  { %32 = vsyncpa [#allocation23], 0 }
  0x10   :  { %33 = vsyncpa [#allocation26], 0  ;;  %s4480_s27 = smov 0   ;;  %s4482_s28 = smov 0  }
  0x11   :  { %s4484_s29 = smov 0   ;;  %s4486_s30 = smov 0  }
  0x12 LB: > { %5255 = sst [smem:[#allocation37_spill]] %s4350_s27  ;;  %s4364_s0 = smov [#allocation4]   ;;  %s4362_s30 = sphi %s4486_s30, %s4882_s30   ;;  %s4358_s29 = sphi %s4484_s29, %s5302_s29   ;;  %s4354_s28 = sphi %s4482_s28, %s5299_s28   ;;  %s4350_s27 = sphi %s4480_s27, %s5301_s27  }
  0x13   : > { %5256 = sst [smem:[#allocation38_spill]] %s4354_s28  ;;  %s465_s19 = sshll.u32 %s4364_s0, 4  ;;  %s4506_s19 = int_to_ptr.vmem [resolvable:$true] %s465_s19 }
  0x14   : > { %5257 = sst [smem:[#allocation39_spill]] %s4358_s29  ;;  %s4501_s1 = sadd.s32 4294967295, %s4362_s30  }
  0x15   : > { %5258 = sst [smem:[#allocation40_spill]] %s4362_s30  ;;  %p2835_p0 = scmp.ge.s32.totalorder %s4362_s30, 1 }
  0x16   : > { %5259 = sst [smem:[#allocation41_spill]] %s4501_s1  ;;  %p5247_p1 = scmp.eq.s32.totalorder %s4501_s1, 0 }
  0x17   : > { %p453_p2 = scmp.lt.s32.totalorder %s4362_s30, 3  ;;  %s4365_s21 = smov [#allocation7]  }
  0x18   : > { %s491_s22 = sshll.u32 %s4365_s21, 4  ;;  %s4366_s23 = smov [#allocation10]   ;;  %s4520_s22 = int_to_ptr.vmem [resolvable:$true] %s491_s22 }
  0x19   : > { %p4508_p3 = pnand %p2835_p0, %p453_p2  ;;  %s517_s24 = sshll.u32 %s4366_s23, 4  ;;  %s4522_s24 = int_to_ptr.vmem [resolvable:$true] %s517_s24 }
  0x1a   : > { %s5263_s0 = sld [smem:[#allocation44_spill]] }
  0x1b   : > { %s5260_s20 = scalar_select %p4508_p3, 1, 0 }
  0x1c   : > { %p3552_p4 = pneg %p4508_p3 }
  0x1d   : > { %5261 = sst [smem:[#allocation42_spill]] %s5260_s20 }
  0x1e   : > { %p4516_p5 = pnand %p3552_p4, %p5247_p1 }
  0x20   : > { %s3818_s18 = scalar_lea.hbm %s5263_s0, 1024  ;;  %p4532_p7 = pneg %p4516_p5 }
  0x21   : > { %p3819_p6 = scmp.ne.s32.totalorder %s5263_s0, %s3818_s18  ;;  %p3825_p10 = scmp.lt.u32.totalorder %s3818_s18, %s5263_s0 }
  0x23   : > { %p3821_p8 = pnand %p4532_p7, %p3819_p6 }
  0x25   : > { %p3822_p9 = pneg %p3821_p8 }
  0x27   : > { %p3827_p11 = pnand %p3825_p10, %p3822_p9 }
  0x29   : > { %3830 = shalt.err (!%p3827_p11)
}
  0x2a   : > { %s3831_s17 = scalar_lea.vmem %s4506_s19, 1024  ;;  %p3839_p2 = scmp.lt.s32.totalorder %s4506_s19, %s4506_s19 }
  0x2b   : > { %p3832_p12 = scmp.ne.s32.totalorder %s4506_s19, %s3831_s17  ;;  %p3840_p4 = scmp.lt.s32.totalorder %s3831_s17, %s3831_s17 }
  0x2d   : > { %p3834_p13 = pnand %p3832_p12, %p4532_p7  ;;  %p3841_p6 = por %p3840_p4, %p3839_p2 }
  0x2f   : > { %p3835_p0 = pneg %p3834_p13 }
  0x31   : > { %p3842_p8 = pnand %p3841_p6, %p3835_p0 }
  0x33   : > { %3845 = shalt.err (!%p3842_p8)
}
  0x34   : > { %s4367_s20 = smov 64   ;;  %s4368_s18 = smov 4  }
  0x35   : > { %3555 = dma.hbm_to_vmem [thread:$0]  (!%p4516_p5), %s5263_s0, 1024, %s4506_s19, [#allocation5], %s4367_s20, %s4367_s20, %s4368_s18  }
  0x36   : > { %s5265_s3 = sld [smem:[#allocation46_spill]] }
  0x3c   : > { %s3846_s17 = scalar_lea.hbm %s5265_s3, 1024 }
  0x3d   : > { %p3847_p9 = scmp.ne.s32.totalorder %s5265_s3, %s3846_s17  ;;  %p3853_p12 = scmp.lt.u32.totalorder %s3846_s17, %s5265_s3 }
  0x3f   : > { %p3849_p10 = pnand %p3847_p9, %p4532_p7 }
  0x41   : > { %p3850_p11 = pneg %p3849_p10 }
  0x43   : > { %p3855_p13 = pnand %p3853_p12, %p3850_p11 }
  0x45   : > { %3858 = shalt.err (!%p3855_p13)
}
  0x46   : > { %s3859_s19 = scalar_lea.vmem %s4520_s22, 1024  ;;  %p3867_p6 = scmp.lt.s32.totalorder %s4520_s22, %s4520_s22 }
  0x47   : > { %p3860_p0 = scmp.ne.s32.totalorder %s4520_s22, %s3859_s19  ;;  %p3868_p8 = scmp.lt.s32.totalorder %s3859_s19, %s3859_s19 }
  0x49   : > { %p3862_p2 = pnand %p3860_p0, %p4532_p7  ;;  %p3869_p9 = por %p3868_p8, %p3867_p6 }
  0x4b   : > { %p3863_p4 = pneg %p3862_p2 }
  0x4d   : > { %p3870_p10 = pnand %p3869_p9, %p3863_p4 }
  0x4f   : > { %3873 = shalt.err (!%p3870_p10)
}
  0x50   : > { %3561 = dma.hbm_to_vmem [thread:$0]  (!%p4516_p5), %s5265_s3, 1024, %s4520_s22, [#allocation8], %s4367_s20, %s4367_s20, %s4368_s18  }
  0x51   : > { %s3874_s1 = scalar_lea.hbm %s5221_s5, 1024 }
  0x52   : > { %p3875_p11 = scmp.ne.s32.totalorder %s5221_s5, %s3874_s1  ;;  %p3881_p0 = scmp.lt.u32.totalorder %s3874_s1, %s5221_s5 }
  0x54   : > { %p3877_p12 = pnand %p3875_p11, %p4532_p7 }
  0x56   : > { %p3878_p13 = pneg %p3877_p12 }
  0x58   : > { %p3883_p2 = pnand %p3881_p0, %p3878_p13 }
  0x5a   : > { %3886 = shalt.err (!%p3883_p2)
}
  0x5b   : > { %s3887_s22 = scalar_lea.vmem %s4522_s24, 1024  ;;  %p3895_p9 = scmp.lt.s32.totalorder %s4522_s24, %s4522_s24 }
  0x5c   : > { %p3888_p4 = scmp.ne.s32.totalorder %s4522_s24, %s3887_s22  ;;  %p3896_p10 = scmp.lt.s32.totalorder %s3887_s22, %s3887_s22 }
  0x5e   : > { %p3890_p6 = pnand %p3888_p4, %p4532_p7  ;;  %p3897_p11 = por %p3896_p10, %p3895_p9 }
  0x60   : > { %p3891_p8 = pneg %p3890_p6 }
  0x62   : > { %p3898_p12 = pnand %p3897_p11, %p3891_p8 }
  0x64   : > { %3901 = shalt.err (!%p3898_p12)
}
  0x65   : > { %3567 = dma.hbm_to_vmem [thread:$0]  (!%p4516_p5), %s5221_s5, 1024, %s4522_s24, [#allocation11], %s4367_s20, %s4367_s20, %s4368_s18  }
  0x66   : > { %s4369_s28 = smov [#allocation13]   ;;  %s4370_s30 = smov [#allocation16]  }
  0x67   : > { %s543_s29 = sshll.u32 %s4369_s28, 4  ;;  %s569_s1 = sshll.u32 %s4370_s30, 4  ;;  %s544_s29 = int_to_ptr.vmem [resolvable:$true] %s543_s29  ;;  %s570_s1 = int_to_ptr.vmem [resolvable:$true] %s569_s1 }
  0x68   : > { %s3902_s23 = scalar_lea.hbm %s5223_s7, 1024 }
  0x69   : > { %p3903_p13 = scmp.ne.s32.totalorder %s5223_s7, %s3902_s23  ;;  %p3909_p4 = scmp.lt.u32.totalorder %s3902_s23, %s5223_s7 }
  0x6b   : > { %p3905_p0 = pnand %p3903_p13, %p4532_p7 }
  0x6d   : > { %p3906_p2 = pneg %p3905_p0 }
  0x6f   : > { %p3911_p6 = pnand %p3909_p4, %p3906_p2 }
  0x71   : > { %3914 = shalt.err (!%p3911_p6)
}
  0x72   : > { %s3915_s24 = scalar_lea.vmem %s544_s29, 1024  ;;  %p3923_p11 = scmp.lt.s32.totalorder %s544_s29, %s544_s29 }
  0x73   : > { %p3916_p8 = scmp.ne.s32.totalorder %s544_s29, %s3915_s24  ;;  %p3924_p12 = scmp.lt.s32.totalorder %s3915_s24, %s3915_s24 }
  0x75   : > { %p3918_p9 = pnand %p3916_p8, %p4532_p7  ;;  %p3925_p1 = por %p3924_p12, %p3923_p11 }
  0x77   : > { %p3919_p10 = pneg %p3918_p9 }
  0x79   : > { %p3926_p3 = pnand %p3925_p1, %p3919_p10 }
  0x7b   : > { %3929 = shalt.err (!%p3926_p3)
}
  0x7c   : > { %3573 = dma.hbm_to_vmem [thread:$0]  (!%p4516_p5), %s5223_s7, 1024, %s544_s29, [#allocation14], %s4367_s20, %s4367_s20, %s4368_s18  }
  0x7d   : > { %s3930_s25 = scalar_lea.hbm %s5225_s9, 1024 }
  0x7e   : > { %p3931_p1 = scmp.ne.s32.totalorder %s5225_s9, %s3930_s25  ;;  %p3937_p0 = scmp.lt.u32.totalorder %s3930_s25, %s5225_s9 }
  0x80   : > { %p3933_p3 = pnand %p3931_p1, %p4532_p7 }
  0x82   : > { %p3934_p13 = pneg %p3933_p3 }
  0x84   : > { %p3939_p2 = pnand %p3937_p0, %p3934_p13 }
  0x86   : > { %3942 = shalt.err (!%p3939_p2)
}
  0x87   : > { %s3943_s19 = scalar_lea.vmem %s570_s1, 1024  ;;  %p3951_p9 = scmp.lt.s32.totalorder %s570_s1, %s570_s1 }
  0x88   : > { %p3944_p4 = scmp.ne.s32.totalorder %s570_s1, %s3943_s19  ;;  %p3952_p10 = scmp.lt.s32.totalorder %s3943_s19, %s3943_s19 }
  0x8a   : > { %p3946_p6 = pnand %p3944_p4, %p4532_p7  ;;  %p3953_p11 = por %p3952_p10, %p3951_p9 }
  0x8c   : > { %p3947_p8 = pneg %p3946_p6 }
  0x8e   : > { %p3954_p12 = pnand %p3953_p11, %p3947_p8 }
  0x90   : > { %3957 = shalt.err (!%p3954_p12)
}
  0x91   : > { %3579 = dma.hbm_to_vmem [thread:$0]  (!%p4516_p5), %s5225_s9, 1024, %s570_s1, [#allocation17], %s4367_s20, %s4367_s20, %s4368_s18  }
  0x92   : > { %s4371_s0 = smov [#allocation19]   ;;  %s4372_s28 = smov [#allocation22]  }
  0x93   : > { %s595_s27 = sshll.u32 %s4371_s0, 4  ;;  %s621_s30 = sshll.u32 %s4372_s28, 4  ;;  %s596_s27 = int_to_ptr.vmem [resolvable:$true] %s595_s27  ;;  %s622_s30 = int_to_ptr.vmem [resolvable:$true] %s621_s30 }
  0x94   : > { %s3958_s23 = scalar_lea.hbm %s5227_s11, 1024 }
  0x95   : > { %p3959_p1 = scmp.ne.s32.totalorder %s5227_s11, %s3958_s23  ;;  %p3965_p0 = scmp.lt.u32.totalorder %s3958_s23, %s5227_s11 }
  0x97   : > { %p3961_p3 = pnand %p3959_p1, %p4532_p7 }
  0x99   : > { %p3962_p13 = pneg %p3961_p3 }
  0x9b   : > { %p3967_p2 = pnand %p3965_p0, %p3962_p13 }
  0x9d   : > { %3970 = shalt.err (!%p3967_p2)
}
  0x9e   : > { %s3971_s1 = scalar_lea.vmem %s596_s27, 1024  ;;  %p3979_p9 = scmp.lt.s32.totalorder %s596_s27, %s596_s27 }
  0x9f   : > { %p3972_p4 = scmp.ne.s32.totalorder %s596_s27, %s3971_s1  ;;  %p3980_p10 = scmp.lt.s32.totalorder %s3971_s1, %s3971_s1 }
  0xa1   : > { %p3974_p6 = pnand %p3972_p4, %p4532_p7  ;;  %p3981_p11 = por %p3980_p10, %p3979_p9 }
  0xa3   : > { %p3975_p8 = pneg %p3974_p6 }
  0xa5   : > { %p3982_p12 = pnand %p3981_p11, %p3975_p8 }
  0xa7   : > { %3985 = shalt.err (!%p3982_p12)
}
  0xa8   : > { %3585 = dma.hbm_to_vmem [thread:$0]  (!%p4516_p5), %s5227_s11, 1024, %s596_s27, [#allocation20], %s4367_s20, %s4367_s20, %s4368_s18  }
  0xa9   : > { %s3986_s26 = scalar_lea.hbm %s5229_s13, 1024 }
  0xaa   : > { %p3987_p1 = scmp.ne.s32.totalorder %s5229_s13, %s3986_s26  ;;  %p3993_p0 = scmp.lt.u32.totalorder %s3986_s26, %s5229_s13 }
  0xac   : > { %p3989_p3 = pnand %p3987_p1, %p4532_p7 }
  0xae   : > { %p3990_p13 = pneg %p3989_p3 }
  0xb0   : > { %p3995_p2 = pnand %p3993_p0, %p3990_p13 }
  0xb2   : > { %3998 = shalt.err (!%p3995_p2)
}
  0xb3   : > { %s3999_s29 = scalar_lea.vmem %s622_s30, 1024  ;;  %p4007_p9 = scmp.lt.s32.totalorder %s622_s30, %s622_s30 }
  0xb4   : > { %p4000_p4 = scmp.ne.s32.totalorder %s622_s30, %s3999_s29  ;;  %p4008_p10 = scmp.lt.s32.totalorder %s3999_s29, %s3999_s29 }
  0xb6   : > { %p4002_p6 = pnand %p4000_p4, %p4532_p7  ;;  %p4009_p11 = por %p4008_p10, %p4007_p9 }
  0xb8   : > { %p4003_p8 = pneg %p4002_p6 }
  0xba   : > { %p4010_p12 = pnand %p4009_p11, %p4003_p8 }
  0xbc   : > { %4013 = shalt.err (!%p4010_p12)
}
  0xbd   : > { %3591 = dma.hbm_to_vmem [thread:$0]  (!%p4516_p5), %s5229_s13, 1024, %s622_s30, [#allocation23], %s4367_s20, %s4367_s20, %s4368_s18  }
  0xbe   : > { %s4373_s24 = smov [#allocation25]   ;;  %s4374_s28 = smov [#allocation6]  }
  0xbf   : > { %s647_s0 = sshll.u32 %s4373_s24, 4  ;;  %s478_s25 = sshll.u32 %s4374_s28, 4  ;;  %s648_s0 = int_to_ptr.vmem [resolvable:$true] %s647_s0  ;;  %s479_s25 = int_to_ptr.vmem [resolvable:$true] %s478_s25 }
  0xc0   : > { %s4014_s17 = scalar_lea.hbm %s5231_s15, 1024 }
  0xc1   : > { %p4015_p1 = scmp.ne.s32.totalorder %s5231_s15, %s4014_s17  ;;  %p4021_p0 = scmp.lt.u32.totalorder %s4014_s17, %s5231_s15 }
  0xc3   : > { %p4017_p3 = pnand %p4015_p1, %p4532_p7 }
  0xc5   : > { %p4018_p13 = pneg %p4017_p3 }
  0xc7   : > { %p4023_p2 = pnand %p4021_p0, %p4018_p13 }
  0xc9   : > { %4026 = shalt.err (!%p4023_p2)
}
  0xca   : > { %s4027_s30 = scalar_lea.vmem %s648_s0, 1024  ;;  %p4035_p9 = scmp.lt.s32.totalorder %s648_s0, %s648_s0 }
  0xcb   : > { %p4028_p4 = scmp.ne.s32.totalorder %s648_s0, %s4027_s30  ;;  %p4036_p10 = scmp.lt.s32.totalorder %s4027_s30, %s4027_s30 }
  0xcd   : > { %p4030_p6 = pnand %p4028_p4, %p4532_p7  ;;  %p4037_p11 = por %p4036_p10, %p4035_p9 }
  0xcf   : > { %p4031_p8 = pneg %p4030_p6 }
  0xd1   : > { %p4038_p12 = pnand %p4037_p11, %p4031_p8 }
  0xd3   : > { %4041 = shalt.err (!%p4038_p12)
}
  0xd4   : > { %3597 = dma.hbm_to_vmem [thread:$0]  (!%p4516_p5), %s5231_s15, 1024, %s648_s0, [#allocation26], %s4367_s20, %s4367_s20, %s4368_s18  }
  0xd5   : > { %s5266_s23 = sld [smem:[#allocation45_spill]] }
  0xdb   : > { %s4042_s17 = scalar_lea.hbm %s5266_s23, 1024 }
  0xdc   : > { %p4043_p1 = scmp.ne.s32.totalorder %s5266_s23, %s4042_s17  ;;  %p4049_p0 = scmp.lt.u32.totalorder %s4042_s17, %s5266_s23 }
  0xde   : > { %p4045_p3 = pnand %p4043_p1, %p4532_p7 }
  0xe0   : > { %p4046_p13 = pneg %p4045_p3 }
  0xe2   : > { %p4051_p2 = pnand %p4049_p0, %p4046_p13 }
  0xe4   : > { %4054 = shalt.err (!%p4051_p2)
}
  0xe5   : > { %s4055_s30 = scalar_lea.vmem %s479_s25, 1024  ;;  %p4063_p9 = scmp.lt.s32.totalorder %s479_s25, %s479_s25 }
  0xe6   : > { %p4056_p4 = scmp.ne.s32.totalorder %s479_s25, %s4055_s30  ;;  %p4064_p10 = scmp.lt.s32.totalorder %s4055_s30, %s4055_s30 }
  0xe8   : > { %p4058_p6 = pnand %p4056_p4, %p4532_p7  ;;  %p4065_p11 = por %p4064_p10, %p4063_p9 }
  0xea   : > { %p4059_p8 = pneg %p4058_p6 }
  0xec   : > { %p4066_p12 = pnand %p4065_p11, %p4059_p8 }
  0xee   : > { %4069 = shalt.err (!%p4066_p12)
}
  0xef   : > { %3558 = dma.hbm_to_vmem [thread:$0]  (!%p4516_p5), %s5266_s23, 1024, %s479_s25, [#allocation5], %s4367_s20, %s4367_s20, %s4368_s18  }
  0xf0   : > { %s4375_s24 = smov [#allocation9]   ;;  %s4376_s26 = smov [#allocation12]  }
  0xf1   : > { %s504_s28 = sshll.u32 %s4375_s24, 4  ;;  %s530_s17 = sshll.u32 %s4376_s26, 4  ;;  %s505_s28 = int_to_ptr.vmem [resolvable:$true] %s504_s28  ;;  %s531_s17 = int_to_ptr.vmem [resolvable:$true] %s530_s17 }
  0xf2   : > { %s4070_s29 = scalar_lea.hbm %s5220_s4, 1024 }
  0xf3   : > { %p4071_p1 = scmp.ne.s32.totalorder %s5220_s4, %s4070_s29  ;;  %p4077_p0 = scmp.lt.u32.totalorder %s4070_s29, %s5220_s4 }
  0xf5   : > { %p4073_p3 = pnand %p4071_p1, %p4532_p7 }
  0xf7   : > { %p4074_p13 = pneg %p4073_p3 }
  0xf9   : > { %p4079_p2 = pnand %p4077_p0, %p4074_p13 }
  0xfb   : > { %4082 = shalt.err (!%p4079_p2)
}
  0xfc   : > { %s4083_s25 = scalar_lea.vmem %s505_s28, 1024  ;;  %p4091_p9 = scmp.lt.s32.totalorder %s505_s28, %s505_s28 }
  0xfd   : > { %p4084_p4 = scmp.ne.s32.totalorder %s505_s28, %s4083_s25  ;;  %p4092_p10 = scmp.lt.s32.totalorder %s4083_s25, %s4083_s25 }
  0xff   : > { %p4086_p6 = pnand %p4084_p4, %p4532_p7  ;;  %p4093_p11 = por %p4092_p10, %p4091_p9 }
 0x101   : > { %p4087_p8 = pneg %p4086_p6 }
 0x103   : > { %p4094_p12 = pnand %p4093_p11, %p4087_p8 }
 0x105   : > { %4097 = shalt.err (!%p4094_p12)
}
 0x106   : > { %3564 = dma.hbm_to_vmem [thread:$0]  (!%p4516_p5), %s5220_s4, 1024, %s505_s28, [#allocation8], %s4367_s20, %s4367_s20, %s4368_s18  }
 0x107   : > { %s4098_s22 = scalar_lea.hbm %s5222_s6, 1024 }
 0x108   : > { %p4099_p1 = scmp.ne.s32.totalorder %s5222_s6, %s4098_s22  ;;  %p4105_p0 = scmp.lt.u32.totalorder %s4098_s22, %s5222_s6 }
 0x10a   : > { %p4101_p3 = pnand %p4099_p1, %p4532_p7 }
 0x10c   : > { %p4102_p13 = pneg %p4101_p3 }
 0x10e   : > { %p4107_p2 = pnand %p4105_p0, %p4102_p13 }
 0x110   : > { %4110 = shalt.err (!%p4107_p2)
}
 0x111   : > { %s4111_s0 = scalar_lea.vmem %s531_s17, 1024  ;;  %p4119_p9 = scmp.lt.s32.totalorder %s531_s17, %s531_s17 }
 0x112   : > { %p4112_p4 = scmp.ne.s32.totalorder %s531_s17, %s4111_s0  ;;  %p4120_p10 = scmp.lt.s32.totalorder %s4111_s0, %s4111_s0 }
 0x114   : > { %p4114_p6 = pnand %p4112_p4, %p4532_p7  ;;  %p4121_p11 = por %p4120_p10, %p4119_p9 }
 0x116   : > { %p4115_p8 = pneg %p4114_p6 }
 0x118   : > { %p4122_p12 = pnand %p4121_p11, %p4115_p8 }
 0x11a   : > { %4125 = shalt.err (!%p4122_p12)
}
 0x11b   : > { %3570 = dma.hbm_to_vmem [thread:$0]  (!%p4516_p5), %s5222_s6, 1024, %s531_s17, [#allocation11], %s4367_s20, %s4367_s20, %s4368_s18  }
 0x11c   : > { %s4377_s3 = smov [#allocation15]   ;;  %s4378_s24 = smov [#allocation18]  }
 0x11d   : > { %s556_s1 = sshll.u32 %s4377_s3, 4  ;;  %s582_s26 = sshll.u32 %s4378_s24, 4  ;;  %s557_s1 = int_to_ptr.vmem [resolvable:$true] %s556_s1  ;;  %s583_s26 = int_to_ptr.vmem [resolvable:$true] %s582_s26 }
 0x11e   : > { %s4126_s29 = scalar_lea.hbm %s5224_s8, 1024 }
 0x11f   : > { %p4127_p1 = scmp.ne.s32.totalorder %s5224_s8, %s4126_s29  ;;  %p4133_p0 = scmp.lt.u32.totalorder %s4126_s29, %s5224_s8 }
 0x121   : > { %p4129_p3 = pnand %p4127_p1, %p4532_p7 }
 0x123   : > { %p4130_p13 = pneg %p4129_p3 }
 0x125   : > { %p4135_p2 = pnand %p4133_p0, %p4130_p13 }
 0x127   : > { %4138 = shalt.err (!%p4135_p2)
}
 0x128   : > { %s4139_s17 = scalar_lea.vmem %s557_s1, 1024  ;;  %p4147_p9 = scmp.lt.s32.totalorder %s557_s1, %s557_s1 }
 0x129   : > { %p4140_p4 = scmp.ne.s32.totalorder %s557_s1, %s4139_s17  ;;  %p4148_p10 = scmp.lt.s32.totalorder %s4139_s17, %s4139_s17 }
 0x12b   : > { %p4142_p6 = pnand %p4140_p4, %p4532_p7  ;;  %p4149_p11 = por %p4148_p10, %p4147_p9 }
 0x12d   : > { %p4143_p8 = pneg %p4142_p6 }
 0x12f   : > { %p4150_p12 = pnand %p4149_p11, %p4143_p8 }
 0x131   : > { %4153 = shalt.err (!%p4150_p12)
}
 0x132   : > { %3576 = dma.hbm_to_vmem [thread:$0]  (!%p4516_p5), %s5224_s8, 1024, %s557_s1, [#allocation14], %s4367_s20, %s4367_s20, %s4368_s18  }
 0x133   : > { %s4154_s19 = scalar_lea.hbm %s5226_s10, 1024 }
 0x134   : > { %p4155_p1 = scmp.ne.s32.totalorder %s5226_s10, %s4154_s19  ;;  %p4161_p0 = scmp.lt.u32.totalorder %s4154_s19, %s5226_s10 }
 0x136   : > { %p4157_p3 = pnand %p4155_p1, %p4532_p7 }
 0x138   : > { %p4158_p13 = pneg %p4157_p3 }
 0x13a   : > { %p4163_p2 = pnand %p4161_p0, %p4158_p13 }
 0x13c   : > { %4166 = shalt.err (!%p4163_p2)
}
 0x13d   : > { %s4167_s28 = scalar_lea.vmem %s583_s26, 1024  ;;  %p4175_p9 = scmp.lt.s32.totalorder %s583_s26, %s583_s26 }
 0x13e   : > { %p4168_p4 = scmp.ne.s32.totalorder %s583_s26, %s4167_s28  ;;  %p4176_p10 = scmp.lt.s32.totalorder %s4167_s28, %s4167_s28 }
 0x140   : > { %p4170_p6 = pnand %p4168_p4, %p4532_p7  ;;  %p4177_p11 = por %p4176_p10, %p4175_p9 }
 0x142   : > { %p4171_p8 = pneg %p4170_p6 }
 0x144   : > { %p4178_p12 = pnand %p4177_p11, %p4171_p8 }
 0x146   : > { %4181 = shalt.err (!%p4178_p12)
}
 0x147   : > { %3582 = dma.hbm_to_vmem [thread:$0]  (!%p4516_p5), %s5226_s10, 1024, %s583_s26, [#allocation17], %s4367_s20, %s4367_s20, %s4368_s18  }
 0x148   : > { %s4379_s25 = smov [#allocation21]   ;;  %s4380_s24 = smov [#allocation24]  }
 0x149   : > { %s608_s3 = sshll.u32 %s4379_s25, 4  ;;  %s634_s22 = sshll.u32 %s4380_s24, 4  ;;  %s609_s3 = int_to_ptr.vmem [resolvable:$true] %s608_s3  ;;  %s635_s22 = int_to_ptr.vmem [resolvable:$true] %s634_s22 }
 0x14a   : > { %s4182_s27 = scalar_lea.hbm %s5228_s12, 1024 }
 0x14b   : > { %p4183_p1 = scmp.ne.s32.totalorder %s5228_s12, %s4182_s27  ;;  %p4189_p0 = scmp.lt.u32.totalorder %s4182_s27, %s5228_s12 }
 0x14d   : > { %p4185_p3 = pnand %p4183_p1, %p4532_p7 }
 0x14f   : > { %p4186_p13 = pneg %p4185_p3 }
 0x151   : > { %p4191_p2 = pnand %p4189_p0, %p4186_p13 }
 0x153   : > { %4194 = shalt.err (!%p4191_p2)
}
 0x154   : > { %s4195_s26 = scalar_lea.vmem %s609_s3, 1024  ;;  %p4203_p9 = scmp.lt.s32.totalorder %s609_s3, %s609_s3 }
 0x155   : > { %p4196_p4 = scmp.ne.s32.totalorder %s609_s3, %s4195_s26  ;;  %p4204_p10 = scmp.lt.s32.totalorder %s4195_s26, %s4195_s26 }
 0x157   : > { %p4198_p6 = pnand %p4196_p4, %p4532_p7  ;;  %p4205_p11 = por %p4204_p10, %p4203_p9 }
 0x159   : > { %p4199_p8 = pneg %p4198_p6 }
 0x15b   : > { %p4206_p12 = pnand %p4205_p11, %p4199_p8 }
 0x15d   : > { %4209 = shalt.err (!%p4206_p12)
}
 0x15e   : > { %3588 = dma.hbm_to_vmem [thread:$0]  (!%p4516_p5), %s5228_s12, 1024, %s609_s3, [#allocation20], %s4367_s20, %s4367_s20, %s4368_s18  }
 0x15f   : > { %s4210_s29 = scalar_lea.hbm %s5230_s14, 1024 }
 0x160   : > { %p4211_p1 = scmp.ne.s32.totalorder %s5230_s14, %s4210_s29  ;;  %p4217_p0 = scmp.lt.u32.totalorder %s4210_s29, %s5230_s14 }
 0x162   : > { %p4213_p3 = pnand %p4211_p1, %p4532_p7 }
 0x164   : > { %p4214_p13 = pneg %p4213_p3 }
 0x166   : > { %p4219_p2 = pnand %p4217_p0, %p4214_p13 }
 0x168   : > { %4222 = shalt.err (!%p4219_p2)
}
 0x169   : > { %s4223_s1 = scalar_lea.vmem %s635_s22, 1024  ;;  %p4231_p9 = scmp.lt.s32.totalorder %s635_s22, %s635_s22 }
 0x16a   : > { %p4224_p4 = scmp.ne.s32.totalorder %s635_s22, %s4223_s1  ;;  %p4232_p10 = scmp.lt.s32.totalorder %s4223_s1, %s4223_s1 }
 0x16c   : > { %p4226_p6 = pnand %p4224_p4, %p4532_p7  ;;  %p4233_p11 = por %p4232_p10, %p4231_p9 }
 0x16e   : > { %p4227_p8 = pneg %p4226_p6 }
 0x170   : > { %p4234_p12 = pnand %p4233_p11, %p4227_p8 }
 0x172   : > { %4237 = shalt.err (!%p4234_p12)
}
 0x173   : > { %3594 = dma.hbm_to_vmem [thread:$0]  (!%p4516_p5), %s5230_s14, 1024, %s635_s22, [#allocation23], %s4367_s20, %s4367_s20, %s4368_s18  }
 0x174   : > { %s4381_s17 = smov [#allocation27]   ;;  %s4238_s29 = scalar_lea.hbm %s5232_s16, 1024 }
 0x175   : > { %s660_s25 = sshll.u32 %s4381_s17, 4  ;;  %p4239_p1 = scmp.ne.s32.totalorder %s5232_s16, %s4238_s29  ;;  %s661_s25 = int_to_ptr.vmem [resolvable:$true] %s660_s25 }
 0x176   : > { %p4245_p0 = scmp.lt.u32.totalorder %s4238_s29, %s5232_s16 }
 0x177   : > { %p4241_p3 = pnand %p4239_p1, %p4532_p7 }
 0x179   : > { %p4242_p13 = pneg %p4241_p3 }
 0x17b   : > { %p4247_p2 = pnand %p4245_p0, %p4242_p13 }
 0x17d   : > { %4250 = shalt.err (!%p4247_p2)
}
 0x17e   : > { %s4251_s22 = scalar_lea.vmem %s661_s25, 1024  ;;  %p4259_p9 = scmp.lt.s32.totalorder %s661_s25, %s661_s25 }
 0x17f   : > { %p4252_p4 = scmp.ne.s32.totalorder %s661_s25, %s4251_s22  ;;  %p4260_p10 = scmp.lt.s32.totalorder %s4251_s22, %s4251_s22 }
 0x181   : > { %p4254_p6 = pnand %p4252_p4, %p4532_p7  ;;  %p4261_p11 = por %p4260_p10, %p4259_p9 }
 0x183   : > { %p4255_p8 = pneg %p4254_p6 }
 0x185   : > { %p4262_p12 = pnand %p4261_p11, %p4255_p8 }
 0x187   : > { %4265 = shalt.err (!%p4262_p12)
}
 0x188   : > { %s5267_s26 = sld [smem:[#allocation40_spill]]  ;;  %s5268_s17 = sld [smem:[#allocation39_spill]] }
 0x189   : > { %s5269_s24 = sld [smem:[#allocation38_spill]]  ;;  %s5270_s21 = sld [smem:[#allocation37_spill]] }
 0x18a   : > { %s5271_s19 = sld [smem:[#allocation41_spill]]  ;;  %s5274_s1 = sld [smem:[#allocation43_spill]] }
 0x18b   : > { %3600 = dma.hbm_to_vmem [thread:$0]  (!%p4516_p5), %s5232_s16, 1024, %s661_s25, [#allocation26], %s4367_s20, %s4367_s20, %s4368_s18  }
 0x18e   : > { %s4882_s30 = sadd.s32 1, %s5267_s26   ;;  %s46_s2 = sadd.s32 1, %s5268_s17 }
 0x18f   : > { %s43_s29 = ssub.s32 %s5267_s26, %s4882_s30  ;;  %p53_p7 = scmp.ne.s32.totalorder %s5268_s17, %s5269_s24 }
 0x190   : > { %p44_p1 = scmp.eq.s32.totalorder %s43_s29, 0  ;;  %p54_p3 = scmp.eq.s32.totalorder %s5267_s26, 0 }
 0x191   : > { %p59_p13 = scmp.ne.s32.totalorder %s5269_s24, %s5270_s21  ;;  %p3621_p0 = scmp.lt.s32.totalorder %s5267_s26, 2 }
 0x192   : > { %s4894_s27 = scalar_select %p44_p1, %s5268_s17, %s46_s2  }
 0x193   : > { %p55_p2 = por %p54_p3, %p53_p7  ;;  %p5272_p4 = scmp.eq.s32.totalorder %s5271_s19, 0 }
 0x194   : > { %s677_s28 = sand.u32 1, %s5268_s17   ;;  %s2854_s20 = sshll.u32 %s5267_s26, 7 }
 0x195   : > { %p4898_p6 = por %p5272_p4, %p59_p13  ;;  %s2853_s18 = sshll.u32 %s677_s28, 3 }
 0x196   : > { %s4907_s3 = scalar_lea.hbm %s5274_s1, %s2854_s20  ;;  %s681_s24 = scalar_lea.vmem [#allocation2], %s2853_s18 }
 0x197   : > { %s688_s21 = sshll.u32 %s681_s24, 4  ;;  %p4909_p5 = pnand %p3621_p0, %p55_p2  ;;  %s4913_s21 = int_to_ptr.vmem [resolvable:$true] %s688_s21 }
 0x198   : > { %s678_s26 = scalar_lea.sflag [#allocation3], %s677_s28  ;;  %s4266_s17 = scalar_lea.hbm %s4907_s3, 128 }
 0x199   : > { %p4267_p8 = scmp.ne.s32.totalorder %s4907_s3, %s4266_s17  ;;  %p4268_p9 = pneg %p4909_p5 }
 0x19a   : > { %s4271_s20 = scalar_lea.hbm %s5274_s1, 256  ;;  %p4272_p12 = scmp.lt.u32.totalorder %s4907_s3, %s5274_s1 }
 0x19b   : > { %p4269_p10 = pnand %p4268_p9, %p4267_p8  ;;  %p4273_p7 = scmp.lt.u32.totalorder %s4271_s20, %s4266_s17 }
 0x19c   : > { %p4275_p3 = scmp.lt.u32.totalorder %s4266_s17, %s4907_s3 }
 0x19d   : > { %p4270_p11 = pneg %p4269_p10  ;;  %p4274_p1 = por %p4273_p7, %p4272_p12 }
 0x19f   : > { %p4276_p13 = por %p4275_p3, %p4274_p1 }
 0x1a1   : > { %p4277_p0 = pnand %p4276_p13, %p4270_p11 }
 0x1a3   : > { %4280 = shalt.err (!%p4277_p0)
}
 0x1a4   : > { %s4281_s28 = scalar_lea.vmem %s4913_s21, 128  ;;  %s4382_s22 = smov [#allocation2]  }
 0x1a5   : > { %p4282_p2 = scmp.ne.s32.totalorder %s4913_s21, %s4281_s28  ;;  %s4286_s24 = sshll.u32 %s4382_s22, 4  ;;  %s4287_s24 = int_to_ptr.vmem [resolvable:$false] %s4286_s24 }
 0x1a6   : > { %s4288_s2 = scalar_lea.vmem %s4287_s24, 256  ;;  %p4289_p10 = scmp.lt.s32.totalorder %s4913_s21, %s4287_s24 }
 0x1a7   : > { %p4284_p4 = pnand %p4282_p2, %p4268_p9  ;;  %p4290_p12 = scmp.lt.s32.totalorder %s4288_s2, %s4281_s28 }
 0x1a9   : > { %p4285_p8 = pneg %p4284_p4  ;;  %p4291_p7 = por %p4290_p12, %p4289_p10 }
 0x1ab   : > { %p4292_p1 = pnand %p4291_p7, %p4285_p8 }
 0x1ad   : > { %4295 = shalt.err (!%p4292_p1)
}
 0x1ae   : > { %3604 = dma.hbm_to_vmem [thread:$0]  (!%p4909_p5), %s4907_s3, 128, %s4913_s21, %s678_s26  }
 0x1af   : > { %s5276_s17 = sld [smem:[#allocation42_spill]] }
 0x1b5   : > { %p5277_p11 = scmp.ne.s32.totalorder %s5276_s17, 0 }
 0x1b6   : > { %s5278_s29 = sld [smem:[#allocation38_spill]] (!%p5277_p11) }
 0x1b7   : > { %697 = sbr.rel (%p5277_p11) target bundleno = 4146 (0x1032), region = 92 }
 0x1bc   : > { %s699_s20 = sand.u32 (!%p5277_p11), 1, %s5278_s29  }
 0x1bd   : > { %s4943_s18 = sshll.u32 (!%p5277_p11), %s699_s20, 3  ;;  %s700_s25 = scalar_lea.sflag (!%p5277_p11), [#allocation3], %s699_s20 }
 0x1be   : > { %s703_s22 = scalar_lea.vmem [#allocation2], %s4943_s18 }
 0x1bf   : > { %4313 = dma.done.wait (%p4898_p6), %s700_s25, 128  }
 0x1c0   : > { %4315 = vsyncadd (%p4898_p6), %s700_s25, 4294967168  ;;  %s5279_s19 = sld [smem:[#allocation41_spill]] }
 0x1c6   : > { %p5280_p9 = scmp.eq.s32.totalorder %s5279_s19, 0 }
 0x1c8   : > { %4317 = dma.done.wait (%p5280_p9), [#allocation5], 2048   ;;  %p5281_p5 = pmov %p5280_p9 }
 0x1ca   : > { %4319 = vsyncadd (%p5281_p5), [#allocation5], 4294965248  ;;  %p5282_p3 = pmov %p5281_p5 }
 0x1cc   : > { %4321 = dma.done.wait (%p5282_p3), [#allocation8], 2048   ;;  %p5283_p13 = pmov %p5282_p3 }
 0x1cd   : > { %p5284_p0 = pmov %p5282_p3 }
 0x1ce   : > { %4323 = vsyncadd (%p5283_p13), [#allocation8], 4294965248 }
 0x1cf   : > { %4325 = dma.done.wait (%p5284_p0), [#allocation11], 2048   ;;  %p5285_p2 = pmov %p5284_p0 }
 0x1d0   : > { %p5286_p6 = pmov %p5284_p0 }
 0x1d1   : > { %4327 = vsyncadd (%p5285_p2), [#allocation11], 4294965248 }
 0x1d2   : > { %4329 = dma.done.wait (%p5286_p6), [#allocation14], 2048   ;;  %p5287_p4 = pmov %p5284_p0 }
 0x1d3   : > { %p5288_p8 = pmov %p5284_p0 }
 0x1d4   : > { %4331 = vsyncadd (%p5287_p4), [#allocation14], 4294965248 }
 0x1d5   : > { %4333 = dma.done.wait (%p5288_p8), [#allocation17], 2048   ;;  %p5289_p10 = pmov %p5284_p0 }
 0x1d6   : > { %p5290_p12 = pmov %p5284_p0 }
 0x1d7   : > { %4335 = vsyncadd (%p5289_p10), [#allocation17], 4294965248 }
 0x1d8   : > { %4337 = dma.done.wait (%p5290_p12), [#allocation20], 2048   ;;  %p5291_p7 = pmov %p5284_p0 }
 0x1d9   : > { %p5292_p1 = pmov %p5284_p0 }
 0x1da   : > { %4339 = vsyncadd (%p5291_p7), [#allocation20], 4294965248 }
 0x1db   : > { %4341 = dma.done.wait (%p5292_p1), [#allocation23], 2048   ;;  %p5293_p11 = pmov %p5284_p0 }
 0x1dc   : > { %p5294_p9 = pmov %p5284_p0 }
 0x1dd   : > { %4343 = vsyncadd (%p5293_p11), [#allocation23], 4294965248 }
 0x1de   : > { %4345 = dma.done.wait (%p5294_p9), [#allocation26], 2048   ;;  %p5295_p5 = pmov %p5284_p0 }
 0x1df   : > { %v4383_v0 = vmov 0.0   ;;  %vm4384_vm0 = vmmov 0   ;;  %v3690_v1 = vld [vmem:[#allocation4] sm:$0xff]   ;;  %v3691_v2 = vld [vmem:[#allocation4 + $0x8] sm:$0xff]   ;;  %v3692_v3 = vld [vmem:[#allocation4 + $0x10] sm:$0xff]   ;;  %s5296_s21 = sld [smem:[#allocation47_spill]] }
 0x1e0   : > { %4347 = vsyncadd (%p5295_p5), [#allocation26], 4294965248  ;;  %3166 = vmatprep.subr.bf16.mxu0 %v4383_v0  ;;  %3182 = vmatprep.mubr.msk.bf16.mxu0 %vm4384_vm0, %v4383_v0  ;;  %v3698_v4 = vld [vmem:[#allocation6] sm:$0xff]   ;;  %v3693_v5 = vld [vmem:[#allocation4 + $0x18] sm:$0xff]   ;;  %p819_p3 = scmp.lt.s32.totalorder %s5279_s19, 1  ;;  %s5297_s28 = sld [smem:[#allocation48_spill]] }
 0x1e1   : > { %3186 = vmatprep.subr.bf16.mxu1 %v4383_v0  ;;  %3202 = vmatprep.mubr.msk.bf16.mxu1 %vm4384_vm0, %v4383_v0  ;;  %v3699_v6 = vld [vmem:[#allocation6 + $0x8] sm:$0xff]   ;;  %v3694_v7 = vld [vmem:[#allocation4 + $0x20] sm:$0xff]   ;;  %v3700_v8 = vld [vmem:[#allocation6 + $0x10] sm:$0xff]   ;;  %vm2615_vm1 = vcmask 7168  }
 0x1e2   : > { %3167 = vmatpush3.bf16.msra.mxu0 %v3690_v1  ;;  %3187 = vmatpush3.bf16.msra.mxu1 %v3698_v4  ;;  %v3695_v9 = vld [vmem:[#allocation4 + $0x28] sm:$0xff]   ;;  %v3701_v10 = vld [vmem:[#allocation6 + $0x18] sm:$0xff]   ;;  %v3696_v11 = vld [vmem:[#allocation4 + $0x30] sm:$0xff]   ;;  %s5304_s19 = smov (!%p819_p3, %s5279_s19), 1 }
 0x1e3   : > { %3168 = vmatprep.subr.bf16.mxu0 %v4383_v0  ;;  %3188 = vmatprep.subr.bf16.mxu1 %v4383_v0  ;;  %v3702_v12 = vld [vmem:[#allocation6 + $0x20] sm:$0xff]   ;;  %v3697_v13 = vld [vmem:[#allocation4 + $0x38] sm:$0xff]   ;;  %v3703_v15 = vld [vmem:[#allocation6 + $0x28] sm:$0xff]   ;;  %s2873_s25 = sshll.u32 %s5304_s19, 3 }
 0x1e4   : > { %v824_v14 = vld [vmem:[%s703_s22] sm:$0xff]  ;;  %v3706_v19 = vld [vmem:[#allocation7] sm:$0xff]   ;;  %v3707_v20 = vld [vmem:[#allocation7 + $0x8] sm:$0xff]  }
 0x1e5   : > { %v859_v16 = vpack.c.bf16 %v824_v14, %v824_v14  ;;  %v3704_v17 = vld [vmem:[#allocation6 + $0x30] sm:$0xff]   ;;  %v3705_v18 = vld [vmem:[#allocation6 + $0x38] sm:$0xff]   ;;  %v3710_v23 = vld [vmem:[#allocation7 + $0x20] sm:$0xff]  }
 0x1e6   : > { %3169 = vmatpush3.bf16.msra.mxu0 %v3691_v2  ;;  %3189 = vmatpush3.bf16.msra.mxu1 %v3699_v6  ;;  %v3708_v21 = vld [vmem:[#allocation7 + $0x10] sm:$0xff]   ;;  %v3709_v22 = vld [vmem:[#allocation7 + $0x18] sm:$0xff]   ;;  %v3711_v24 = vld [vmem:[#allocation7 + $0x28] sm:$0xff]   ;;  %s822_s24 = scalar_lea.vmem %s5297_s28, %s2873_s25 }
 0x1e7   : > { %3170 = vmatprep.subr.bf16.mxu0 %v4383_v0  ;;  %3190 = vmatprep.subr.bf16.mxu1 %v4383_v0  ;;  %v2874_v25 = vld [vmem:[%s5296_s21] ss:$0 sm:$0xff]  ;;  %v3712_v33 = vld [vmem:[#allocation7 + $0x30] sm:$0xff]   ;;  %v3714_v35 = vld [vmem:[#allocation9] sm:$0xff]  }
 0x1e8   : > { %v3713_v34 = vld [vmem:[#allocation7 + $0x38] sm:$0xff]   ;;  %v3715_v36 = vld [vmem:[#allocation9 + $0x8] sm:$0xff]   ;;  %v3716_v37 = vld [vmem:[#allocation9 + $0x10] sm:$0xff]  }
 0x1e9   : > { %v3717_v38 = vld [vmem:[#allocation9 + $0x18] sm:$0xff]   ;;  %v3718_v39 = vld [vmem:[#allocation9 + $0x20] sm:$0xff]   ;;  %v3719_v40 = vld [vmem:[#allocation9 + $0x28] sm:$0xff]  }
 0x1ea   : > { %3171 = vmatpush3.bf16.msra.mxu0 %v3692_v3  ;;  %3191 = vmatpush3.bf16.msra.mxu1 %v3700_v8  ;;  %v2883_v41 = vld [vmem:[%s5296_s21 + $0x1] ss:$0 sm:$0xff]  ;;  %v3720_v49 = vld [vmem:[#allocation9 + $0x30] sm:$0xff]   ;;  %v3722_v51 = vld [vmem:[#allocation10] sm:$0xff]  }
 0x1eb   : > { %3172 = vmatprep.subr.bf16.mxu0 %v4383_v0  ;;  %3192 = vmatprep.subr.bf16.mxu1 %v4383_v0  ;;  %v3721_v50 = vld [vmem:[#allocation9 + $0x38] sm:$0xff]   ;;  %v3723_v52 = vld [vmem:[#allocation10 + $0x8] sm:$0xff]   ;;  %v3724_v53 = vld [vmem:[#allocation10 + $0x10] sm:$0xff]  }
 0x1ec   : > { %v3725_v54 = vld [vmem:[#allocation10 + $0x18] sm:$0xff]   ;;  %v3726_v55 = vld [vmem:[#allocation10 + $0x20] sm:$0xff]   ;;  %v3727_v56 = vld [vmem:[#allocation10 + $0x28] sm:$0xff]  }
 0x1ed   : > { %v2892_v57 = vld [vmem:[%s5296_s21 + $0x2] ss:$0 sm:$0xff]  ;;  %v3728_v2 = vld [vmem:[#allocation10 + $0x30] sm:$0xff]   ;;  %v3730_v4 = vld [vmem:[#allocation12] sm:$0xff]  }
 0x1ee   : > { %3173 = vmatpush3.bf16.msra.mxu0 %v3693_v5  ;;  %3193 = vmatpush3.bf16.msra.mxu1 %v3701_v10  ;;  %v3729_v3 = vld [vmem:[#allocation10 + $0x38] sm:$0xff]   ;;  %v3731_v5 = vld [vmem:[#allocation12 + $0x8] sm:$0xff]   ;;  %v3732_v6 = vld [vmem:[#allocation12 + $0x10] sm:$0xff]  }
 0x1ef   : > { %3174 = vmatprep.subr.bf16.mxu0 %v4383_v0  ;;  %3194 = vmatprep.subr.bf16.mxu1 %v4383_v0  ;;  %v3734_v8 = vld [vmem:[#allocation12 + $0x20] sm:$0xff]   ;;  %v2901_v10 = vld [vmem:[%s5296_s21 + $0x3] ss:$0 sm:$0xff] }
 0x1f2   : > { %3175 = vmatpush3.bf16.msra.mxu0 %v3694_v7  ;;  %3195 = vmatpush3.bf16.msra.mxu1 %v3702_v12  ;;  %v3733_v7 = vld [vmem:[#allocation12 + $0x18] sm:$0xff]  }
 0x1f3   : > { %3176 = vmatprep.subr.bf16.mxu0 %v4383_v0  ;;  %3196 = vmatprep.subr.bf16.mxu1 %v4383_v0 }
 0x1f6   : > { %3177 = vmatpush3.bf16.msra.mxu0 %v3695_v9  ;;  %3197 = vmatpush3.bf16.msra.mxu1 %v3703_v15  ;;  %v3735_v9 = vld [vmem:[#allocation12 + $0x28] sm:$0xff]  }
 0x1f7   : > { %3178 = vmatprep.subr.bf16.mxu0 %v4383_v0  ;;  %3198 = vmatprep.subr.bf16.mxu1 %v4383_v0 }
 0x1fa   : > { %3179 = vmatpush3.bf16.msra.mxu0 %v3696_v11  ;;  %3199 = vmatpush3.bf16.msra.mxu1 %v3704_v17 }
 0x1fb   : > { %3180 = vmatprep.subr.bf16.mxu0 %v4383_v0  ;;  %3200 = vmatprep.subr.bf16.mxu1 %v4383_v0 }
 0x1fe   : > { %3181 = vmatpush3.bf16.msra.mxu0 %v3697_v13  ;;  %3201 = vmatpush3.bf16.msra.mxu1 %v3705_v18  ;;  %v3736_v18 = vld [vmem:[#allocation12 + $0x30] sm:$0xff]  }
 0x1ff   : > { %3206 = vmatprep.subr.bf16.mxu0 %v4383_v0  ;;  %3226 = vmatprep.subr.bf16.mxu1 %v4383_v0 }
 0x201   : > { %3183 = vmatmul.mubr.bf16.vlgmr.msra.gmra.mrb[0].mxu0 %v859_v16 }
 0x202   : > { %3222 = vmatprep.mubr.msk.bf16.mxu0 %vm4384_vm0, %v4383_v0  ;;  %3207 = vmatpush3.bf16.msra.mxu0 %v3706_v19  ;;  %v3737_v19 = vld [vmem:[#allocation12 + $0x38] sm:$0xff]  }
 0x203   : > { %3208 = vmatprep.subr.bf16.mxu0 %v4383_v0 }
 0x206   : > { %3209 = vmatpush3.bf16.msra.mxu0 %v3707_v20  ;;  %v3738_v20 = vld [vmem:[#allocation13] sm:$0xff]  }
 0x207   : > { %3210 = vmatprep.subr.bf16.mxu0 %v4383_v0 }
 0x20a   : > { %3211 = vmatpush3.bf16.msra.mxu0 %v3708_v21  ;;  %v3739_v21 = vld [vmem:[#allocation13 + $0x8] sm:$0xff]  }
 0x20b   : > { %3212 = vmatprep.subr.bf16.mxu0 %v4383_v0 }
 0x20e   : > { %3213 = vmatpush3.bf16.msra.mxu0 %v3709_v22  ;;  %v3740_v22 = vld [vmem:[#allocation13 + $0x10] sm:$0xff]  }
 0x20f   : > { %3214 = vmatprep.subr.bf16.mxu0 %v4383_v0 }
 0x212   : > { %3215 = vmatpush3.bf16.msra.mxu0 %v3710_v23  ;;  %v3741_v23 = vld [vmem:[#allocation13 + $0x18] sm:$0xff]  }
 0x213   : > { %3216 = vmatprep.subr.bf16.mxu0 %v4383_v0 }
 0x216   : > { %3217 = vmatpush3.bf16.msra.mxu0 %v3711_v24  ;;  %v3742_v24 = vld [vmem:[#allocation13 + $0x20] sm:$0xff]  }
 0x217   : > { %3218 = vmatprep.subr.bf16.mxu0 %v4383_v0 }
 0x21a   : > { %3219 = vmatpush3.bf16.msra.mxu0 %v3712_v33 }
 0x21b   : > { %3220 = vmatprep.subr.bf16.mxu0 %v4383_v0 }
 0x21e   : > { %3221 = vmatpush3.bf16.msra.mxu0 %v3713_v34  ;;  %v3744_v34 = vld [vmem:[#allocation13 + $0x30] sm:$0xff]  }
 0x21f   : > { %3246 = vmatprep.subr.bf16.mxu0 %v4383_v0 }
 0x2d4   : > { %v946_v26 = vpop.f32.mrb[0].mxu0 }
 0x2d5   : > { %v947_v27 = vadd.f32 %v2874_v25, %v946_v26  ;;  %v3184_v28 = vpop.f32.mrb[1].mxu0  ;;  %v3743_v25 = vld [vmem:[#allocation13 + $0x28] sm:$0xff]   ;;  %v2910_v26 = vld [vmem:[%s5296_s21 + $0x4] ss:$0 sm:$0xff] }
 0x2d6   : > { %v949_v29 = vpop.f32.mrb[2].mxu0 }
 0x2d7   : > { %v952_v30 = vmax.f32 %v947_v27, 0.0  ;;  %v3185_v31 = vpop.f32.mrb[3].mxu0 }
 0x2d9   : > { %v953_v32 = vpack.c.bf16 %v952_v30, %v952_v30 }
 0x2db   : > { %3203 = vmatmul.mubr.bf16.vlgmr.msra.gmra.mrb[0].mxu1 %v953_v32 }
 0x2dc   : > { %3242 = vmatprep.mubr.msk.bf16.mxu1 %vm4384_vm0, %v4383_v0  ;;  %3227 = vmatpush3.bf16.msra.mxu1 %v3714_v35  ;;  %v3745_v35 = vld [vmem:[#allocation13 + $0x38] sm:$0xff]  }
 0x2dd   : > { %3228 = vmatprep.subr.bf16.mxu1 %v4383_v0 }
 0x2e0   : > { %3229 = vmatpush3.bf16.msra.mxu1 %v3715_v36  ;;  %v3746_v36 = vld [vmem:[#allocation15] sm:$0xff]  }
 0x2e1   : > { %3230 = vmatprep.subr.bf16.mxu1 %v4383_v0 }
 0x2e4   : > { %3231 = vmatpush3.bf16.msra.mxu1 %v3716_v37  ;;  %v3747_v37 = vld [vmem:[#allocation15 + $0x8] sm:$0xff]  }
 0x2e5   : > { %3232 = vmatprep.subr.bf16.mxu1 %v4383_v0 }
 0x2e8   : > { %3233 = vmatpush3.bf16.msra.mxu1 %v3717_v38  ;;  %v3748_v38 = vld [vmem:[#allocation15 + $0x10] sm:$0xff]  }
 0x2e9   : > { %3234 = vmatprep.subr.bf16.mxu1 %v4383_v0 }
 0x2ec   : > { %3235 = vmatpush3.bf16.msra.mxu1 %v3718_v39  ;;  %v3749_v39 = vld [vmem:[#allocation15 + $0x18] sm:$0xff]  }
 0x2ed   : > { %3236 = vmatprep.subr.bf16.mxu1 %v4383_v0 }
 0x2f0   : > { %3237 = vmatpush3.bf16.msra.mxu1 %v3719_v40  ;;  %v3750_v40 = vld [vmem:[#allocation15 + $0x20] sm:$0xff]  }
 0x2f1   : > { %3238 = vmatprep.subr.bf16.mxu1 %v4383_v0 }
 0x2f4   : > { %3239 = vmatpush3.bf16.msra.mxu1 %v3720_v49 }
 0x2f5   : > { %3240 = vmatprep.subr.bf16.mxu1 %v4383_v0 }
 0x2f8   : > { %3241 = vmatpush3.bf16.msra.mxu1 %v3721_v50  ;;  %v3752_v50 = vld [vmem:[#allocation15 + $0x30] sm:$0xff]  }
 0x2f9   : > { %3266 = vmatprep.subr.bf16.mxu1 %v4383_v0 }
 0x3ae   : > { %v1040_v42 = vpop.f32.mrb[0].mxu1 }
 0x3af   : > { %v1041_v43 = vadd.f32 %v2883_v41, %v1040_v42  ;;  %v3204_v44 = vpop.f32.mrb[1].mxu1  ;;  %v3751_v41 = vld [vmem:[#allocation15 + $0x28] sm:$0xff]   ;;  %v2919_v42 = vld [vmem:[%s5296_s21 + $0x5] ss:$0 sm:$0xff] }
 0x3b0   : > { %v1043_v45 = vpop.f32.mrb[2].mxu1 }
 0x3b1   : > { %v1046_v46 = vmax.f32 %v1041_v43, 0.0  ;;  %v3205_v47 = vpop.f32.mrb[3].mxu1 }
 0x3b3   : > { %v1081_v48 = vpack.c.bf16 %v1046_v46, %v1046_v46 }
 0x3b5   : > { %3223 = vmatmul.mubr.bf16.vlgmr.msra.gmra.mrb[4].mxu0 %v1081_v48 }
 0x3b6   : > { %3262 = vmatprep.mubr.msk.bf16.mxu0 %vm4384_vm0, %v4383_v0  ;;  %3247 = vmatpush3.bf16.msra.mxu0 %v3722_v51  ;;  %v3753_v51 = vld [vmem:[#allocation15 + $0x38] sm:$0xff]  }
 0x3b7   : > { %3248 = vmatprep.subr.bf16.mxu0 %v4383_v0 }
 0x3ba   : > { %3249 = vmatpush3.bf16.msra.mxu0 %v3723_v52  ;;  %v3754_v52 = vld [vmem:[#allocation16] sm:$0xff]  }
 0x3bb   : > { %3250 = vmatprep.subr.bf16.mxu0 %v4383_v0 }
 0x3be   : > { %3251 = vmatpush3.bf16.msra.mxu0 %v3724_v53  ;;  %v3755_v53 = vld [vmem:[#allocation16 + $0x8] sm:$0xff]  }
 0x3bf   : > { %3252 = vmatprep.subr.bf16.mxu0 %v4383_v0 }
 0x3c2   : > { %3253 = vmatpush3.bf16.msra.mxu0 %v3725_v54  ;;  %v3756_v54 = vld [vmem:[#allocation16 + $0x10] sm:$0xff]  }
 0x3c3   : > { %3254 = vmatprep.subr.bf16.mxu0 %v4383_v0 }
 0x3c6   : > { %3255 = vmatpush3.bf16.msra.mxu0 %v3726_v55  ;;  %v3757_v55 = vld [vmem:[#allocation16 + $0x18] sm:$0xff]  }
 0x3c7   : > { %3256 = vmatprep.subr.bf16.mxu0 %v4383_v0 }
 0x3ca   : > { %3257 = vmatpush3.bf16.msra.mxu0 %v3727_v56  ;;  %v3758_v56 = vld [vmem:[#allocation16 + $0x20] sm:$0xff]  }
 0x3cb   : > { %3258 = vmatprep.subr.bf16.mxu0 %v4383_v0 }
 0x3ce   : > { %3259 = vmatpush3.bf16.msra.mxu0 %v3728_v2 }
 0x3cf   : > { %3260 = vmatprep.subr.bf16.mxu0 %v4383_v0 }
 0x3d2   : > { %3261 = vmatpush3.bf16.msra.mxu0 %v3729_v3  ;;  %v3760_v3 = vld [vmem:[#allocation16 + $0x30] sm:$0xff]  }
 0x3d3   : > { %3286 = vmatprep.subr.bf16.mxu0 %v4383_v0 }
 0x488   : > { %v1168_v58 = vpop.f32.mrb[4].mxu0 }
 0x489   : > { %v1169_v59 = vadd.f32 %v2892_v57, %v1168_v58  ;;  %v3224_v60 = vpop.f32.mrb[5].mxu0  ;;  %v3759_v57 = vld [vmem:[#allocation16 + $0x28] sm:$0xff]   ;;  %v2928_v58 = vld [vmem:[%s5296_s21 + $0x6] ss:$0 sm:$0xff] }
 0x48a   : > { %v1171_v61 = vpop.f32.mrb[6].mxu0 }
 0x48b   : > { %v1174_v62 = vmax.f32 %v1169_v59, 0.0  ;;  %v3225_v63 = vpop.f32.mrb[7].mxu0 }
 0x48d   : > { %v1175_v1 = vpack.c.bf16 %v1174_v62, %v1174_v62 }
 0x48f   : > { %3243 = vmatmul.mubr.bf16.vlgmr.msra.gmra.mrb[4].mxu1 %v1175_v1 }
 0x490   : > { %3282 = vmatprep.mubr.msk.bf16.mxu1 %vm4384_vm0, %v4383_v0  ;;  %3267 = vmatpush3.bf16.msra.mxu1 %v3730_v4  ;;  %v3761_v4 = vld [vmem:[#allocation16 + $0x38] sm:$0xff]  }
 0x491   : > { %3268 = vmatprep.subr.bf16.mxu1 %v4383_v0 }
 0x494   : > { %3269 = vmatpush3.bf16.msra.mxu1 %v3731_v5  ;;  %v3762_v5 = vld [vmem:[#allocation18] sm:$0xff]  }
 0x495   : > { %3270 = vmatprep.subr.bf16.mxu1 %v4383_v0 }
 0x498   : > { %3271 = vmatpush3.bf16.msra.mxu1 %v3732_v6  ;;  %v3763_v6 = vld [vmem:[#allocation18 + $0x8] sm:$0xff]  }
 0x499   : > { %3272 = vmatprep.subr.bf16.mxu1 %v4383_v0 }
 0x49c   : > { %3273 = vmatpush3.bf16.msra.mxu1 %v3733_v7  ;;  %v3764_v7 = vld [vmem:[#allocation18 + $0x10] sm:$0xff]  }
 0x49d   : > { %3274 = vmatprep.subr.bf16.mxu1 %v4383_v0 }
 0x4a0   : > { %3275 = vmatpush3.bf16.msra.mxu1 %v3734_v8  ;;  %v3765_v8 = vld [vmem:[#allocation18 + $0x18] sm:$0xff]  }
 0x4a1   : > { %3276 = vmatprep.subr.bf16.mxu1 %v4383_v0 }
 0x4a4   : > { %3277 = vmatpush3.bf16.msra.mxu1 %v3735_v9  ;;  %v3766_v9 = vld [vmem:[#allocation18 + $0x20] sm:$0xff]  }
 0x4a5   : > { %3278 = vmatprep.subr.bf16.mxu1 %v4383_v0 }
 0x4a8   : > { %3279 = vmatpush3.bf16.msra.mxu1 %v3736_v18 }
 0x4a9   : > { %3280 = vmatprep.subr.bf16.mxu1 %v4383_v0 }
 0x4ac   : > { %3281 = vmatpush3.bf16.msra.mxu1 %v3737_v19  ;;  %v3768_v19 = vld [vmem:[#allocation18 + $0x30] sm:$0xff]  }
 0x4ad   : > { %3306 = vmatprep.subr.bf16.mxu1 %v4383_v0 }
 0x562   : > { %v1262_v11 = vpop.f32.mrb[4].mxu1 }
 0x563   : > { %v1263_v12 = vadd.f32 %v2901_v10, %v1262_v11  ;;  %v3244_v13 = vpop.f32.mrb[5].mxu1  ;;  %v3767_v10 = vld [vmem:[#allocation18 + $0x28] sm:$0xff]   ;;  %v2937_v11 = vld [vmem:[%s5296_s21 + $0x7] ss:$0 sm:$0xff] }
 0x564   : > { %v1265_v14 = vpop.f32.mrb[6].mxu1 }
 0x565   : > { %v1268_v15 = vmax.f32 %v1263_v12, 0.0  ;;  %v3245_v16 = vpop.f32.mrb[7].mxu1 }
 0x567   : > { %v1303_v17 = vpack.c.bf16 %v1268_v15, %v1268_v15 }
 0x569   : > { %3263 = vmatmul.mubr.bf16.vlgmr.msra.gmra.mrb[8].mxu0 %v1303_v17 }
 0x56a   : > { %3302 = vmatprep.mubr.msk.bf16.mxu0 %vm4384_vm0, %v4383_v0  ;;  %3287 = vmatpush3.bf16.msra.mxu0 %v3738_v20  ;;  %v3769_v20 = vld [vmem:[#allocation18 + $0x38] sm:$0xff]  }
 0x56b   : > { %3288 = vmatprep.subr.bf16.mxu0 %v4383_v0 }
 0x56e   : > { %3289 = vmatpush3.bf16.msra.mxu0 %v3739_v21  ;;  %v3770_v21 = vld [vmem:[#allocation19] sm:$0xff]  }
 0x56f   : > { %3290 = vmatprep.subr.bf16.mxu0 %v4383_v0 }
 0x572   : > { %3291 = vmatpush3.bf16.msra.mxu0 %v3740_v22  ;;  %v3771_v22 = vld [vmem:[#allocation19 + $0x8] sm:$0xff]  }
 0x573   : > { %3292 = vmatprep.subr.bf16.mxu0 %v4383_v0 }
 0x576   : > { %3293 = vmatpush3.bf16.msra.mxu0 %v3741_v23  ;;  %v3772_v23 = vld [vmem:[#allocation19 + $0x10] sm:$0xff]  }
 0x577   : > { %3294 = vmatprep.subr.bf16.mxu0 %v4383_v0 }
 0x57a   : > { %3295 = vmatpush3.bf16.msra.mxu0 %v3742_v24  ;;  %v3773_v24 = vld [vmem:[#allocation19 + $0x18] sm:$0xff]  }
 0x57b   : > { %3296 = vmatprep.subr.bf16.mxu0 %v4383_v0 }
 0x57e   : > { %3297 = vmatpush3.bf16.msra.mxu0 %v3743_v25  ;;  %v3774_v25 = vld [vmem:[#allocation19 + $0x20] sm:$0xff]  }
 0x57f   : > { %3298 = vmatprep.subr.bf16.mxu0 %v4383_v0 }
 0x582   : > { %3299 = vmatpush3.bf16.msra.mxu0 %v3744_v34 }
 0x583   : > { %3300 = vmatprep.subr.bf16.mxu0 %v4383_v0 }
 0x586   : > { %3301 = vmatpush3.bf16.msra.mxu0 %v3745_v35  ;;  %v3776_v35 = vld [vmem:[#allocation19 + $0x30] sm:$0xff]  }
 0x587   : > { %3326 = vmatprep.subr.bf16.mxu0 %v4383_v0 }
 0x63c   : > { %v1390_v27 = vpop.f32.mrb[8].mxu0 }
 0x63d   : > { %v1391_v28 = vadd.f32 %v2910_v26, %v1390_v27  ;;  %v3264_v29 = vpop.f32.mrb[9].mxu0  ;;  %v3775_v26 = vld [vmem:[#allocation19 + $0x28] sm:$0xff]   ;;  %v2946_v27 = vld [vmem:[%s5296_s21 + $0x8] ss:$0 sm:$0xff] }
 0x63e   : > { %v1393_v30 = vpop.f32.mrb[10].mxu0 }
 0x63f   : > { %v1396_v31 = vmax.f32 %v1391_v28, 0.0  ;;  %v3265_v32 = vpop.f32.mrb[11].mxu0 }
 0x641   : > { %v1397_v33 = vpack.c.bf16 %v1396_v31, %v1396_v31 }
 0x643   : > { %3283 = vmatmul.mubr.bf16.vlgmr.msra.gmra.mrb[8].mxu1 %v1397_v33 }
 0x644   : > { %3322 = vmatprep.mubr.msk.bf16.mxu1 %vm4384_vm0, %v4383_v0  ;;  %3307 = vmatpush3.bf16.msra.mxu1 %v3746_v36  ;;  %v3777_v36 = vld [vmem:[#allocation19 + $0x38] sm:$0xff]  }
 0x645   : > { %3308 = vmatprep.subr.bf16.mxu1 %v4383_v0 }
 0x648   : > { %3309 = vmatpush3.bf16.msra.mxu1 %v3747_v37  ;;  %v3778_v37 = vld [vmem:[#allocation21] sm:$0xff]  }
 0x649   : > { %3310 = vmatprep.subr.bf16.mxu1 %v4383_v0 }
 0x64c   : > { %3311 = vmatpush3.bf16.msra.mxu1 %v3748_v38  ;;  %v3779_v38 = vld [vmem:[#allocation21 + $0x8] sm:$0xff]  }
 0x64d   : > { %3312 = vmatprep.subr.bf16.mxu1 %v4383_v0 }
 0x650   : > { %3313 = vmatpush3.bf16.msra.mxu1 %v3749_v39  ;;  %v3780_v39 = vld [vmem:[#allocation21 + $0x10] sm:$0xff]  }
 0x651   : > { %3314 = vmatprep.subr.bf16.mxu1 %v4383_v0 }
 0x654   : > { %3315 = vmatpush3.bf16.msra.mxu1 %v3750_v40  ;;  %v3781_v40 = vld [vmem:[#allocation21 + $0x18] sm:$0xff]  }
 0x655   : > { %3316 = vmatprep.subr.bf16.mxu1 %v4383_v0 }
 0x658   : > { %3317 = vmatpush3.bf16.msra.mxu1 %v3751_v41  ;;  %v3782_v41 = vld [vmem:[#allocation21 + $0x20] sm:$0xff]  }
 0x659   : > { %3318 = vmatprep.subr.bf16.mxu1 %v4383_v0 }
 0x65c   : > { %3319 = vmatpush3.bf16.msra.mxu1 %v3752_v50 }
 0x65d   : > { %3320 = vmatprep.subr.bf16.mxu1 %v4383_v0 }
 0x660   : > { %3321 = vmatpush3.bf16.msra.mxu1 %v3753_v51  ;;  %v3784_v51 = vld [vmem:[#allocation21 + $0x30] sm:$0xff]  }
 0x661   : > { %3346 = vmatprep.subr.bf16.mxu1 %v4383_v0 }
 0x716   : > { %v1484_v43 = vpop.f32.mrb[8].mxu1 }
 0x717   : > { %v1485_v44 = vadd.f32 %v2919_v42, %v1484_v43  ;;  %v3284_v45 = vpop.f32.mrb[9].mxu1  ;;  %v3783_v42 = vld [vmem:[#allocation21 + $0x28] sm:$0xff]   ;;  %v2955_v43 = vld [vmem:[%s5296_s21 + $0x9] ss:$0 sm:$0xff] }
 0x718   : > { %v1487_v46 = vpop.f32.mrb[10].mxu1 }
 0x719   : > { %v1490_v47 = vmax.f32 %v1485_v44, 0.0  ;;  %v3285_v48 = vpop.f32.mrb[11].mxu1 }
 0x71b   : > { %v1525_v49 = vpack.c.bf16 %v1490_v47, %v1490_v47 }
 0x71d   : > { %3303 = vmatmul.mubr.bf16.vlgmr.msra.gmra.mrb[12].mxu0 %v1525_v49 }
 0x71e   : > { %3342 = vmatprep.mubr.msk.bf16.mxu0 %vm4384_vm0, %v4383_v0  ;;  %3327 = vmatpush3.bf16.msra.mxu0 %v3754_v52  ;;  %v3785_v52 = vld [vmem:[#allocation21 + $0x38] sm:$0xff]  }
 0x71f   : > { %3328 = vmatprep.subr.bf16.mxu0 %v4383_v0 }
 0x722   : > { %3329 = vmatpush3.bf16.msra.mxu0 %v3755_v53  ;;  %v3786_v53 = vld [vmem:[#allocation22] sm:$0xff]  }
 0x723   : > { %3330 = vmatprep.subr.bf16.mxu0 %v4383_v0 }
 0x726   : > { %3331 = vmatpush3.bf16.msra.mxu0 %v3756_v54  ;;  %v3787_v54 = vld [vmem:[#allocation22 + $0x8] sm:$0xff]  }
 0x727   : > { %3332 = vmatprep.subr.bf16.mxu0 %v4383_v0 }
 0x72a   : > { %3333 = vmatpush3.bf16.msra.mxu0 %v3757_v55  ;;  %v3788_v55 = vld [vmem:[#allocation22 + $0x10] sm:$0xff]  }
 0x72b   : > { %3334 = vmatprep.subr.bf16.mxu0 %v4383_v0 }
 0x72e   : > { %3335 = vmatpush3.bf16.msra.mxu0 %v3758_v56  ;;  %v3789_v56 = vld [vmem:[#allocation22 + $0x18] sm:$0xff]  }
 0x72f   : > { %3336 = vmatprep.subr.bf16.mxu0 %v4383_v0 }
 0x732   : > { %3337 = vmatpush3.bf16.msra.mxu0 %v3759_v57  ;;  %v3790_v57 = vld [vmem:[#allocation22 + $0x20] sm:$0xff]  }
 0x733   : > { %3338 = vmatprep.subr.bf16.mxu0 %v4383_v0 }
 0x736   : > { %3339 = vmatpush3.bf16.msra.mxu0 %v3760_v3 }
 0x737   : > { %3340 = vmatprep.subr.bf16.mxu0 %v4383_v0 }
 0x73a   : > { %3341 = vmatpush3.bf16.msra.mxu0 %v3761_v4  ;;  %v3792_v4 = vld [vmem:[#allocation22 + $0x30] sm:$0xff]  }
 0x73b   : > { %3366 = vmatprep.subr.bf16.mxu0 %v4383_v0 }
 0x7f0   : > { %v1612_v59 = vpop.f32.mrb[12].mxu0 }
 0x7f1   : > { %v1613_v60 = vadd.f32 %v2928_v58, %v1612_v59  ;;  %v3304_v61 = vpop.f32.mrb[13].mxu0  ;;  %v3791_v58 = vld [vmem:[#allocation22 + $0x28] sm:$0xff]   ;;  %v2964_v59 = vld [vmem:[%s5296_s21 + $0xa] ss:$0 sm:$0xff] }
 0x7f2   : > { %v1615_v62 = vpop.f32.mrb[14].mxu0 }
 0x7f3   : > { %v1618_v63 = vmax.f32 %v1613_v60, 0.0  ;;  %v3305_v1 = vpop.f32.mrb[15].mxu0 }
 0x7f5   : > { %v1619_v2 = vpack.c.bf16 %v1618_v63, %v1618_v63 }
 0x7f7   : > { %3323 = vmatmul.mubr.bf16.vlgmr.msra.gmra.mrb[12].mxu1 %v1619_v2 }
 0x7f8   : > { %3362 = vmatprep.mubr.msk.bf16.mxu1 %vm4384_vm0, %v4383_v0  ;;  %3347 = vmatpush3.bf16.msra.mxu1 %v3762_v5  ;;  %v3793_v5 = vld [vmem:[#allocation22 + $0x38] sm:$0xff]  }
 0x7f9   : > { %3348 = vmatprep.subr.bf16.mxu1 %v4383_v0 }
 0x7fc   : > { %3349 = vmatpush3.bf16.msra.mxu1 %v3763_v6  ;;  %v3794_v6 = vld [vmem:[#allocation24] sm:$0xff]  }
 0x7fd   : > { %3350 = vmatprep.subr.bf16.mxu1 %v4383_v0 }
 0x800   : > { %3351 = vmatpush3.bf16.msra.mxu1 %v3764_v7  ;;  %v3795_v7 = vld [vmem:[#allocation24 + $0x8] sm:$0xff]  }
 0x801   : > { %3352 = vmatprep.subr.bf16.mxu1 %v4383_v0 }
 0x804   : > { %3353 = vmatpush3.bf16.msra.mxu1 %v3765_v8  ;;  %v3796_v8 = vld [vmem:[#allocation24 + $0x10] sm:$0xff]  }
 0x805   : > { %3354 = vmatprep.subr.bf16.mxu1 %v4383_v0 }
 0x808   : > { %3355 = vmatpush3.bf16.msra.mxu1 %v3766_v9  ;;  %v3797_v9 = vld [vmem:[#allocation24 + $0x18] sm:$0xff]  }
 0x809   : > { %3356 = vmatprep.subr.bf16.mxu1 %v4383_v0 }
 0x80c   : > { %3357 = vmatpush3.bf16.msra.mxu1 %v3767_v10  ;;  %v3798_v10 = vld [vmem:[#allocation24 + $0x20] sm:$0xff]  }
 0x80d   : > { %3358 = vmatprep.subr.bf16.mxu1 %v4383_v0 }
 0x810   : > { %3359 = vmatpush3.bf16.msra.mxu1 %v3768_v19 }
 0x811   : > { %3360 = vmatprep.subr.bf16.mxu1 %v4383_v0 }
 0x814   : > { %3361 = vmatpush3.bf16.msra.mxu1 %v3769_v20  ;;  %v3800_v20 = vld [vmem:[#allocation24 + $0x30] sm:$0xff]  }
 0x815   : > { %3386 = vmatprep.subr.bf16.mxu1 %v4383_v0 }
 0x8ca   : > { %v1706_v12 = vpop.f32.mrb[12].mxu1 }
 0x8cb   : > { %v1707_v13 = vadd.f32 %v2937_v11, %v1706_v12  ;;  %v3324_v14 = vpop.f32.mrb[13].mxu1  ;;  %v3799_v11 = vld [vmem:[#allocation24 + $0x28] sm:$0xff]   ;;  %v2973_v12 = vld [vmem:[%s5296_s21 + $0xb] ss:$0 sm:$0xff] }
 0x8cc   : > { %v1709_v15 = vpop.f32.mrb[14].mxu1 }
 0x8cd   : > { %v1712_v16 = vmax.f32 %v1707_v13, 0.0  ;;  %v3325_v17 = vpop.f32.mrb[15].mxu1 }
 0x8cf   : > { %v1747_v18 = vpack.c.bf16 %v1712_v16, %v1712_v16 }
 0x8d1   : > { %3343 = vmatmul.mubr.bf16.vlgmr.msra.gmra.mrb[16].mxu0 %v1747_v18 }
 0x8d2   : > { %3382 = vmatprep.mubr.msk.bf16.mxu0 %vm4384_vm0, %v4383_v0  ;;  %3367 = vmatpush3.bf16.msra.mxu0 %v3770_v21  ;;  %v3801_v21 = vld [vmem:[#allocation24 + $0x38] sm:$0xff]  }
 0x8d3   : > { %3368 = vmatprep.subr.bf16.mxu0 %v4383_v0 }
 0x8d6   : > { %3369 = vmatpush3.bf16.msra.mxu0 %v3771_v22  ;;  %v3802_v22 = vld [vmem:[#allocation25] sm:$0xff]  }
 0x8d7   : > { %3370 = vmatprep.subr.bf16.mxu0 %v4383_v0 }
 0x8da   : > { %3371 = vmatpush3.bf16.msra.mxu0 %v3772_v23  ;;  %v3803_v23 = vld [vmem:[#allocation25 + $0x8] sm:$0xff]  }
 0x8db   : > { %3372 = vmatprep.subr.bf16.mxu0 %v4383_v0 }
 0x8de   : > { %3373 = vmatpush3.bf16.msra.mxu0 %v3773_v24  ;;  %v3804_v24 = vld [vmem:[#allocation25 + $0x10] sm:$0xff]  }
 0x8df   : > { %3374 = vmatprep.subr.bf16.mxu0 %v4383_v0 }
 0x8e2   : > { %3375 = vmatpush3.bf16.msra.mxu0 %v3774_v25  ;;  %v3805_v25 = vld [vmem:[#allocation25 + $0x18] sm:$0xff]  }
 0x8e3   : > { %3376 = vmatprep.subr.bf16.mxu0 %v4383_v0 }
 0x8e6   : > { %3377 = vmatpush3.bf16.msra.mxu0 %v3775_v26  ;;  %v3806_v26 = vld [vmem:[#allocation25 + $0x20] sm:$0xff]  }
 0x8e7   : > { %3378 = vmatprep.subr.bf16.mxu0 %v4383_v0 }
 0x8ea   : > { %3379 = vmatpush3.bf16.msra.mxu0 %v3776_v35 }
 0x8eb   : > { %3380 = vmatprep.subr.bf16.mxu0 %v4383_v0 }
 0x8ee   : > { %3381 = vmatpush3.bf16.msra.mxu0 %v3777_v36  ;;  %v3808_v36 = vld [vmem:[#allocation25 + $0x30] sm:$0xff]  }
 0x8ef   : > { %3406 = vmatprep.subr.bf16.mxu0 %v4383_v0 }
 0x9a4   : > { %v1834_v28 = vpop.f32.mrb[16].mxu0 }
 0x9a5   : > { %v1835_v29 = vadd.f32 %v2946_v27, %v1834_v28  ;;  %v3344_v30 = vpop.f32.mrb[17].mxu0  ;;  %v3807_v27 = vld [vmem:[#allocation25 + $0x28] sm:$0xff]   ;;  %v2982_v28 = vld [vmem:[%s5296_s21 + $0xc] ss:$0 sm:$0xff] }
 0x9a6   : > { %v1837_v31 = vpop.f32.mrb[18].mxu0 }
 0x9a7   : > { %v1840_v32 = vmax.f32 %v1835_v29, 0.0  ;;  %v3345_v33 = vpop.f32.mrb[19].mxu0 }
 0x9a9   : > { %v1841_v34 = vpack.c.bf16 %v1840_v32, %v1840_v32 }
 0x9ab   : > { %3363 = vmatmul.mubr.bf16.vlgmr.msra.gmra.mrb[16].mxu1 %v1841_v34 }
 0x9ac   : > { %3402 = vmatprep.mubr.msk.bf16.mxu1 %vm4384_vm0, %v4383_v0  ;;  %3387 = vmatpush3.bf16.msra.mxu1 %v3778_v37  ;;  %v3809_v37 = vld [vmem:[#allocation25 + $0x38] sm:$0xff]  }
 0x9ad   : > { %3388 = vmatprep.subr.bf16.mxu1 %v4383_v0 }
 0x9b0   : > { %3389 = vmatpush3.bf16.msra.mxu1 %v3779_v38  ;;  %v3810_v38 = vld [vmem:[#allocation27] sm:$0xff]  }
 0x9b1   : > { %3390 = vmatprep.subr.bf16.mxu1 %v4383_v0 }
 0x9b4   : > { %3391 = vmatpush3.bf16.msra.mxu1 %v3780_v39  ;;  %v3811_v39 = vld [vmem:[#allocation27 + $0x8] sm:$0xff]  }
 0x9b5   : > { %3392 = vmatprep.subr.bf16.mxu1 %v4383_v0 }
 0x9b8   : > { %3393 = vmatpush3.bf16.msra.mxu1 %v3781_v40  ;;  %v3812_v40 = vld [vmem:[#allocation27 + $0x10] sm:$0xff]  }
 0x9b9   : > { %3394 = vmatprep.subr.bf16.mxu1 %v4383_v0 }
 0x9bc   : > { %3395 = vmatpush3.bf16.msra.mxu1 %v3782_v41  ;;  %v3813_v41 = vld [vmem:[#allocation27 + $0x18] sm:$0xff]  }
 0x9bd   : > { %3396 = vmatprep.subr.bf16.mxu1 %v4383_v0 }
 0x9c0   : > { %3397 = vmatpush3.bf16.msra.mxu1 %v3783_v42  ;;  %v3814_v42 = vld [vmem:[#allocation27 + $0x20] sm:$0xff]  }
 0x9c1   : > { %3398 = vmatprep.subr.bf16.mxu1 %v4383_v0 }
 0x9c4   : > { %3399 = vmatpush3.bf16.msra.mxu1 %v3784_v51 }
 0x9c5   : > { %3400 = vmatprep.subr.bf16.mxu1 %v4383_v0 }
 0x9c8   : > { %3401 = vmatpush3.bf16.msra.mxu1 %v3785_v52  ;;  %v3816_v52 = vld [vmem:[#allocation27 + $0x30] sm:$0xff]  }
 0x9c9   : > { %3426 = vmatprep.subr.bf16.mxu1 %v4383_v0 }
 0xa7e   : > { %v1928_v44 = vpop.f32.mrb[16].mxu1 }
 0xa7f   : > { %v1929_v45 = vadd.f32 %v2955_v43, %v1928_v44  ;;  %v3364_v46 = vpop.f32.mrb[17].mxu1  ;;  %v3815_v43 = vld [vmem:[#allocation27 + $0x28] sm:$0xff]   ;;  %v2991_v44 = vld [vmem:[%s5296_s21 + $0xd] ss:$0 sm:$0xff] }
 0xa80   : > { %v1931_v47 = vpop.f32.mrb[18].mxu1 }
 0xa81   : > { %v1934_v48 = vmax.f32 %v1929_v45, 0.0  ;;  %v3365_v49 = vpop.f32.mrb[19].mxu1 }
 0xa83   : > { %v1969_v50 = vpack.c.bf16 %v1934_v48, %v1934_v48 }
 0xa85   : > { %3383 = vmatmul.mubr.bf16.vlgmr.msra.gmra.mrb[20].mxu0 %v1969_v50 }
 0xa86   : > { %3422 = vmatprep.mubr.msk.bf16.mxu0 %vm4384_vm0, %v4383_v0  ;;  %3407 = vmatpush3.bf16.msra.mxu0 %v3786_v53  ;;  %v3817_v53 = vld [vmem:[#allocation27 + $0x38] sm:$0xff]  }
 0xa87   : > { %3408 = vmatprep.subr.bf16.mxu0 %v4383_v0 }
 0xa8a   : > { %3409 = vmatpush3.bf16.msra.mxu0 %v3787_v54  ;;  %v3000_v54 = vld [vmem:[%s5296_s21 + $0xe] ss:$0 sm:$0xff] }
 0xa8b   : > { %3410 = vmatprep.subr.bf16.mxu0 %v4383_v0 }
 0xa8e   : > { %3411 = vmatpush3.bf16.msra.mxu0 %v3788_v55 }
 0xa8f   : > { %3412 = vmatprep.subr.bf16.mxu0 %v4383_v0 }
 0xa92   : > { %3413 = vmatpush3.bf16.msra.mxu0 %v3789_v56 }
 0xa93   : > { %3414 = vmatprep.subr.bf16.mxu0 %v4383_v0 }
 0xa96   : > { %3415 = vmatpush3.bf16.msra.mxu0 %v3790_v57 }
 0xa97   : > { %3416 = vmatprep.subr.bf16.mxu0 %v4383_v0 }
 0xa9a   : > { %3417 = vmatpush3.bf16.msra.mxu0 %v3791_v58 }
 0xa9b   : > { %3418 = vmatprep.subr.bf16.mxu0 %v4383_v0 }
 0xa9e   : > { %3419 = vmatpush3.bf16.msra.mxu0 %v3792_v4 }
 0xa9f   : > { %3420 = vmatprep.subr.bf16.mxu0 %v4383_v0 }
 0xaa2   : > { %3421 = vmatpush3.bf16.msra.mxu0 %v3793_v5 }
 0xaa3   : > { %3446 = vmatprep.subr.bf16.mxu0 %v4383_v0 }
 0xb58   : > { %v2056_v60 = vpop.f32.mrb[20].mxu0 }
 0xb59   : > { %v2057_v61 = vadd.f32 %v2964_v59, %v2056_v60  ;;  %v3384_v62 = vpop.f32.mrb[21].mxu0 }
 0xb5a   : > { %v2059_v63 = vpop.f32.mrb[22].mxu0 }
 0xb5b   : > { %v2062_v1 = vmax.f32 %v2057_v61, 0.0  ;;  %v3385_v2 = vpop.f32.mrb[23].mxu0 }
 0xb5d   : > { %v2063_v3 = vpack.c.bf16 %v2062_v1, %v2062_v1 }
 0xb5f   : > { %3403 = vmatmul.mubr.bf16.vlgmr.msra.gmra.mrb[20].mxu1 %v2063_v3  ;;  %v3018_v3 = vld [vmem:[%s5296_s21 + $0x10] ss:$0 sm:$0xff] }
 0xb60   : > { %3442 = vmatprep.mubr.msk.bf16.mxu1 %vm4384_vm0, %v4383_v0  ;;  %3427 = vmatpush3.bf16.msra.mxu1 %v3794_v6 }
 0xb61   : > { %3428 = vmatprep.subr.bf16.mxu1 %v4383_v0 }
 0xb64   : > { %3429 = vmatpush3.bf16.msra.mxu1 %v3795_v7  ;;  %v3019_v7 = vld [vmem:[%s5296_s21 + $0x11] ss:$0 sm:$0xff] }
 0xb65   : > { %3430 = vmatprep.subr.bf16.mxu1 %v4383_v0 }
 0xb68   : > { %3431 = vmatpush3.bf16.msra.mxu1 %v3796_v8 }
 0xb69   : > { %3432 = vmatprep.subr.bf16.mxu1 %v4383_v0 }
 0xb6c   : > { %3433 = vmatpush3.bf16.msra.mxu1 %v3797_v9 }
 0xb6d   : > { %3434 = vmatprep.subr.bf16.mxu1 %v4383_v0 }
 0xb70   : > { %3435 = vmatpush3.bf16.msra.mxu1 %v3798_v10 }
 0xb71   : > { %3436 = vmatprep.subr.bf16.mxu1 %v4383_v0 }
 0xb74   : > { %3437 = vmatpush3.bf16.msra.mxu1 %v3799_v11 }
 0xb75   : > { %3438 = vmatprep.subr.bf16.mxu1 %v4383_v0 }
 0xb78   : > { %3439 = vmatpush3.bf16.msra.mxu1 %v3800_v20 }
 0xb79   : > { %3440 = vmatprep.subr.bf16.mxu1 %v4383_v0 }
 0xb7c   : > { %3441 = vmatpush3.bf16.msra.mxu1 %v3801_v21 }
 0xb7d   : > { %3466 = vmatprep.subr.bf16.mxu1 %v4383_v0 }
 0xc32   : > { %v2150_v13 = vpop.f32.mrb[20].mxu1 }
 0xc33   : > { %v2151_v14 = vadd.f32 %v2973_v12, %v2150_v13  ;;  %v3404_v15 = vpop.f32.mrb[21].mxu1 }
 0xc34   : > { %v2153_v16 = vpop.f32.mrb[22].mxu1 }
 0xc35   : > { %v2156_v17 = vmax.f32 %v2151_v14, 0.0  ;;  %v3405_v18 = vpop.f32.mrb[23].mxu1 }
 0xc37   : > { %v2191_v19 = vpack.c.bf16 %v2156_v17, %v2156_v17 }
 0xc39   : > { %3423 = vmatmul.mubr.bf16.vlgmr.msra.gmra.mrb[24].mxu0 %v2191_v19 }
 0xc3a   : > { %3462 = vmatprep.mubr.msk.bf16.mxu0 %vm4384_vm0, %v4383_v0  ;;  %3447 = vmatpush3.bf16.msra.mxu0 %v3802_v22 }
 0xc3b   : > { %3448 = vmatprep.subr.bf16.mxu0 %v4383_v0 }
 0xc3e   : > { %3449 = vmatpush3.bf16.msra.mxu0 %v3803_v23 }
 0xc3f   : > { %3450 = vmatprep.subr.bf16.mxu0 %v4383_v0 }
 0xc42   : > { %3451 = vmatpush3.bf16.msra.mxu0 %v3804_v24 }
 0xc43   : > { %3452 = vmatprep.subr.bf16.mxu0 %v4383_v0 }
 0xc46   : > { %3453 = vmatpush3.bf16.msra.mxu0 %v3805_v25 }
 0xc47   : > { %3454 = vmatprep.subr.bf16.mxu0 %v4383_v0 }
 0xc4a   : > { %3455 = vmatpush3.bf16.msra.mxu0 %v3806_v26 }
 0xc4b   : > { %3456 = vmatprep.subr.bf16.mxu0 %v4383_v0 }
 0xc4e   : > { %3457 = vmatpush3.bf16.msra.mxu0 %v3807_v27 }
 0xc4f   : > { %3458 = vmatprep.subr.bf16.mxu0 %v4383_v0 }
 0xc52   : > { %3459 = vmatpush3.bf16.msra.mxu0 %v3808_v36 }
 0xc53   : > { %3460 = vmatprep.subr.bf16.mxu0 %v4383_v0 }
 0xc56   : > { %3461 = vmatpush3.bf16.msra.mxu0 %v3809_v37 }
 0xd0c   : > { %v2278_v29 = vpop.f32.mrb[24].mxu0 }
 0xd0d   : > { %v2279_v30 = vadd.f32 %v2982_v28, %v2278_v29  ;;  %v3424_v31 = vpop.f32.mrb[25].mxu0 }
 0xd0e   : > { %v2281_v32 = vpop.f32.mrb[26].mxu0 }
 0xd0f   : > { %v2284_v33 = vmax.f32 %v2279_v30, 0.0  ;;  %v3425_v34 = vpop.f32.mrb[27].mxu0 }
 0xd11   : > { %v2285_v35 = vpack.c.bf16 %v2284_v33, %v2284_v33 }
 0xd13   : > { %3443 = vmatmul.mubr.bf16.vlgmr.msra.gmra.mrb[24].mxu1 %v2285_v35 }
 0xd14   : > { %3482 = vmatprep.mubr.msk.bf16.mxu1 %vm4384_vm0, %v4383_v0  ;;  %3467 = vmatpush3.bf16.msra.mxu1 %v3810_v38 }
 0xd15   : > { %3468 = vmatprep.subr.bf16.mxu1 %v4383_v0 }
 0xd18   : > { %3469 = vmatpush3.bf16.msra.mxu1 %v3811_v39 }
 0xd19   : > { %3470 = vmatprep.subr.bf16.mxu1 %v4383_v0 }
 0xd1c   : > { %3471 = vmatpush3.bf16.msra.mxu1 %v3812_v40 }
 0xd1d   : > { %3472 = vmatprep.subr.bf16.mxu1 %v4383_v0 }
 0xd20   : > { %3473 = vmatpush3.bf16.msra.mxu1 %v3813_v41 }
 0xd21   : > { %3474 = vmatprep.subr.bf16.mxu1 %v4383_v0 }
 0xd24   : > { %3475 = vmatpush3.bf16.msra.mxu1 %v3814_v42 }
 0xd25   : > { %3476 = vmatprep.subr.bf16.mxu1 %v4383_v0 }
 0xd28   : > { %3477 = vmatpush3.bf16.msra.mxu1 %v3815_v43 }
 0xd29   : > { %3478 = vmatprep.subr.bf16.mxu1 %v4383_v0 }
 0xd2c   : > { %3479 = vmatpush3.bf16.msra.mxu1 %v3816_v52 }
 0xd2d   : > { %3480 = vmatprep.subr.bf16.mxu1 %v4383_v0  ;;  %v3009_v0 = vld [vmem:[%s5296_s21 + $0xf] ss:$0 sm:$0xff] }
 0xd30   : > { %3481 = vmatpush3.bf16.msra.mxu1 %v3817_v53 }
 0xde6   : > { %v2372_v45 = vpop.f32.mrb[24].mxu1 }
 0xde7   : > { %v2373_v46 = vadd.f32 %v2991_v44, %v2372_v45  ;;  %v3444_v47 = vpop.f32.mrb[25].mxu1 }
 0xde8   : > { %v2375_v48 = vpop.f32.mrb[26].mxu1 }
 0xde9   : > { %v2378_v49 = vmax.f32 %v2373_v46, 0.0  ;;  %v3445_v50 = vpop.f32.mrb[27].mxu1 }
 0xdeb   : > { %v2413_v51 = vpack.c.bf16 %v2378_v49, %v2378_v49 }
 0xded   : > { %3463 = vmatmul.mubr.bf16.vlgmr.msra.gmra.mrb[28].mxu0 %v2413_v51 }
 0xec0   : > { %v2500_v55 = vpop.f32.mrb[28].mxu0 }
 0xec1   : > { %v2501_v56 = vadd.f32 %v3000_v54, %v2500_v55  ;;  %v3464_v57 = vpop.f32.mrb[29].mxu0 }
 0xec2   : > { %v2503_v58 = vpop.f32.mrb[30].mxu0 }
 0xec3   : > { %v2506_v59 = vmax.f32 %v2501_v56, 0.0  ;;  %v3465_v60 = vpop.f32.mrb[31].mxu0 }
 0xec5   : > { %v2507_v61 = vpack.c.bf16 %v2506_v59, %v2506_v59 }
 0xec7   : > { %3483 = vmatmul.mubr.bf16.vlgmr.msra.gmra.mrb[28].mxu1 %v2507_v61 }
 0xf9a   : > { %v2594_v62 = vpop.f32.mrb[28].mxu1 }
 0xf9b   : > { %v2595_v63 = vadd.f32 %v3009_v0, %v2594_v62  ;;  %v3484_v1 = vpop.f32.mrb[29].mxu1 }
 0xf9c   : > { %v2597_v2 = vpop.f32.mrb[30].mxu1 }
 0xf9d   : > { %v2600_v4 = vmax.f32 %v2595_v63, 0.0  ;;  %v3485_v5 = vpop.f32.mrb[31].mxu1 }
 0xf9f   : > { %v2607_v6 = vmul.f32 %v3018_v3, %v2600_v4 }
 0xfa1   : > { %2608 = vadd.xlane.f32.xlu0 %v2607_v6 }
0x102e   : > { %v2609_v8 = vpop.xlane.xlu0 %2608 }
0x102f   : > { %v2614_v9 = vadd.f32 %v3019_v7, %v2609_v8 }
0x1031   : > { %2616 = vst.msk [vmem:[%s822_s24] sm:$0xff] %vm2615_vm1, %v2614_v9 }
0x1032 PF: > { %s5298_s2 = sld [smem:[#allocation38_spill]]  ;;  %s5299_s28 = sld [smem:[#allocation39_spill]] }
0x1033   : > { %s5300_s17 = smov %s4894_s27  ;;  %p36_p13 = scmp.ge.s32.totalorder %s4882_s30, 4  }
0x1034   : > { %s5302_s29 = smov %s5300_s17 }
0x1035   :  { %38 = sbr.rel (!%p36_p13) target bundleno = 18 (0x12), region = 196 }
0x1038   : > { %s5301_s27 = smov %s5298_s2 }
0x103c   :  { %2636 = vsyncpa [#allocation3], 1 }
0x103d   :  { %2638 = vsyncpa [#allocation3 + $0x1], 1 }
0x103e   :  { %2639 = vsyncpa [#allocation5], 1 }
0x103f   :  { %2640 = vsyncpa [#allocation8], 1 }
0x1040   :  { %2641 = vsyncpa [#allocation11], 1 }
0x1041   :  { %2642 = vsyncpa [#allocation14], 1 }
0x1042   :  { %2643 = vsyncpa [#allocation17], 1 }
0x1043   :  { %2644 = vsyncpa [#allocation20], 1 }
0x1044   :  { %2645 = vsyncpa [#allocation23], 1 }
0x1045   :  { %2646 = vsyncpa [#allocation26], 1 }

</bundles_post_ra>
